<compile_context>
chip_gen: v7x
topology: tpu7x:2x2x1
jax: 0.10.0
libtpu: 0.0.40
codegen_flags: <defaults>
</compile_context>

<pallas_src>
import jax
import jax.numpy as jnp
from jax.experimental import pallas as pl
from jax.experimental.pallas import tpu as pltpu


def _gated_attn_kernel(x_ref, wa_ref, ba_ref, wb_ref, bb_ref, wc_ref, bc_ref,
                       out_ref, acc_a, acc_b):
    """One row-tile of Attn_Net_Gated, accumulated over L (reduction) tiles."""
    k = pl.program_id(1)

    @pl.when(k == 0)
    def _init():
        # Seed the accumulators with the biases so the epilogue is activation-only.
        acc_a[...] = jnp.broadcast_to(ba_ref[...], acc_a.shape).astype(jnp.float32)
        acc_b[...] = jnp.broadcast_to(bb_ref[...], acc_b.shape).astype(jnp.float32)

    x = x_ref[...]
    acc_a[...] += jnp.dot(x, wa_ref[...], preferred_element_type=jnp.float32)
    acc_b[...] += jnp.dot(x, wb_ref[...], preferred_element_type=jnp.float32)

    @pl.when(k == pl.num_programs(1) - 1)
    def _finalize():
        a = jnp.tanh(acc_a[...])                        # EUP
        b = jax.nn.sigmoid(acc_b[...])                  # EUP
        gated = a * b                                   # VPU
        # attention_c: Linear(D -> 1). wc_ref is [1, D]; a weighted-sum lane reduce
        # keeps the MXU free and the (tn, 1) output block's last dim equals the full
        # output dim (legal, and output traffic is negligible: 4 bytes/row).
        A = jnp.sum(gated * wc_ref[...], axis=1, keepdims=True) + bc_ref[...]
        out_ref[...] = A.astype(out_ref.dtype)


def _pick_row_tile(N):
    """Row (sublane) tile: as large as reasonable, bounded padding waste."""
    if N < 128:
        return ((N + 7) // 8) * 8
    for t in (512, 256, 128):
        padded = ((N + t - 1) // t) * t
        if padded - N <= padded // 8:     # <= ~12.5% padding waste
            return t
    return 128


def _pick_reduction_tile(L, D, tn, budget_bytes=12 * 1024 * 1024):
    """Reduction (L) tile.

    Prefer the full L: then the weight blocks have constant indices, are DMA'd once and
    stay VMEM-resident across all row tiles.  Fall back to 128-multiples for huge L.
    """
    full_bytes = 4 * (2 * (2 * L * D)     # Wa, Wb (count double buffers conservatively)
                      + 2 * tn * L        # x tile, double-buffered
                      + 2 * tn * D)       # accumulators
    if full_bytes <= budget_bytes:
        return L
    for t in (512, 256, 128):
        if L % t == 0:
            return t
    return L


def attn_net_gated_forward(x, params):
    """x: [N, L] f32 -> A: [N, 1] f32 (unnormalized attention logits)."""
    N, L = x.shape
    wa, ba = params["wa"], params["ba"]
    wb, bb = params["wb"], params["bb"]
    wc, bc = params["wc"], params["bc"]
    D = wa.shape[1]
    assert wa.shape == (L, D) and wb.shape == (L, D)
    assert ba.shape == (1, D) and bb.shape == (1, D)
    assert wc.shape == (1, D) and bc.shape == (1, 1)

    tn = _pick_row_tile(N)
    tl = _pick_reduction_tile(L, D, tn)

    Np = ((N + tn - 1) // tn) * tn
    if Np != N:
        x = jnp.pad(x, ((0, Np - N), (0, 0)))

    grid = (Np // tn, L // tl)

    cost = pl.CostEstimate(
        flops=2 * 2 * Np * L * D + 3 * Np * D,          # two matmuls + gating/reduce
        transcendentals=2 * Np * D,                     # tanh + sigmoid
        bytes_accessed=4 * (Np * L + 2 * L * D + 3 * D + 1 + Np),
    )

    out = pl.pallas_call(
        _gated_attn_kernel,
        out_shape=jax.ShapeDtypeStruct((Np, 1), jnp.float32),
        grid_spec=pltpu.PrefetchScalarGridSpec(
            num_scalar_prefetch=0,
            grid=grid,
            in_specs=[
                pl.BlockSpec((tn, tl), lambda i, k: (i, k)),   # x
                pl.BlockSpec((tl, D), lambda i, k: (k, 0)),    # Wa (resident if tl==L)
                pl.BlockSpec((1, D), lambda i, k: (0, 0)),     # ba
                pl.BlockSpec((tl, D), lambda i, k: (k, 0)),    # Wb (resident if tl==L)
                pl.BlockSpec((1, D), lambda i, k: (0, 0)),     # bb
                pl.BlockSpec((1, D), lambda i, k: (0, 0)),     # Wc (row layout)
                pl.BlockSpec((1, 1), lambda i, k: (0, 0)),     # bc
            ],
            out_specs=pl.BlockSpec((tn, 1), lambda i, k: (i, 0)),
            scratch_shapes=[pltpu.VMEM((tn, D), jnp.float32),  # acc_a
                            pltpu.VMEM((tn, D), jnp.float32)], # acc_b
        ),
        compiler_params=pltpu.CompilerParams(
            dimension_semantics=("parallel", "arbitrary"),
            vmem_limit_bytes=32 * 1024 * 1024,
        ),
        cost_estimate=cost,
    )(x, wa, ba, wb, bb, wc, bc)

    return out[:N]


def init_params(key, *, L, D):
    k1, k2, k3, k4, k5, k6 = jax.random.split(key, 6)
    return {
        "wa": jax.random.normal(k1, (L, D), jnp.float32) * (L ** -0.5),
        "ba": jax.random.normal(k2, (1, D), jnp.float32) * 0.01,
        "wb": jax.random.normal(k3, (L, D), jnp.float32) * (L ** -0.5),
        "bb": jax.random.normal(k4, (1, D), jnp.float32) * 0.01,
        "wc": jax.random.normal(k5, (1, D), jnp.float32) * (D ** -0.5),
        "bc": jax.random.normal(k6, (1, 1), jnp.float32) * 0.01,
    }


if __name__ == "__main__":
    key = jax.random.PRNGKey(0)
    k_x, k_par = jax.random.split(key, 2)

    # Module defaults: L=512 input features, D=384 hidden; small "bag" of 16 instances.
    N, L, D = 16, 512, 384
    x = jax.random.normal(k_x, (N, L), jnp.float32)
    params = init_params(k_par, L=L, D=D)

    A = attn_net_gated_forward(x, params)
    jax.block_until_ready(A)

    # Reference (plain JAX, same math as the PyTorch module's forward).
    a_ref = jnp.tanh(x @ params["wa"] + params["ba"])
    b_ref = jax.nn.sigmoid(x @ params["wb"] + params["bb"])
    A_ref = (a_ref * b_ref) @ params["wc"].T + params["bc"]

    assert A.shape == (N, 1)
    assert bool(jnp.all(jnp.isfinite(A)))
    assert bool(jnp.allclose(A, A_ref, atol=2e-2, rtol=2e-2)), \
        float(jnp.max(jnp.abs(A - A_ref)))

    print("KERNEL_OK")
</pallas_src>

<mosaic_0001>
module attributes {stable_mosaic.version = 11 : i64} {
  func.func @_gated_attn_kernel(%arg0: i32, %arg1: i32, %arg2: memref<16x512xf32, #tpu.memory_space<vmem>>, %arg3: memref<512x384xf32, #tpu.memory_space<vmem>>, %arg4: memref<1x384xf32, #tpu.memory_space<vmem>>, %arg5: memref<512x384xf32, #tpu.memory_space<vmem>>, %arg6: memref<1x384xf32, #tpu.memory_space<vmem>>, %arg7: memref<1x384xf32, #tpu.memory_space<vmem>>, %arg8: memref<1x1xf32, #tpu.memory_space<vmem>>, %arg9: memref<16x1xf32, #tpu.memory_space<vmem>>, %arg10: memref<16x384xf32, #tpu.memory_space<vmem>>, %arg11: memref<16x384xf32, #tpu.memory_space<vmem>>) attributes {dimension_semantics = [#tpu.dimension_semantics<parallel>, #tpu.dimension_semantics<arbitrary>], iteration_bounds = array<i64: 1, 1>, scalar_prefetch = 0 : i64, scratch_operands = 2 : i64, tpu.core_type = #tpu.core_type<tc>, window_params = [{transform_indices = @transform_0, window_bounds = array<i64: 16, 512>}, {transform_indices = @transform_1, window_bounds = array<i64: 512, 384>}, {pipeline_mode = #tpu.pipeline_mode<synchronous>, transform_indices = @transform_2, window_bounds = array<i64: 1, 384>}, {transform_indices = @transform_3, window_bounds = array<i64: 512, 384>}, {pipeline_mode = #tpu.pipeline_mode<synchronous>, transform_indices = @transform_4, window_bounds = array<i64: 1, 384>}, {pipeline_mode = #tpu.pipeline_mode<synchronous>, transform_indices = @transform_5, window_bounds = array<i64: 1, 384>}, {pipeline_mode = #tpu.pipeline_mode<synchronous>, transform_indices = @transform_6, window_bounds = array<i64: 1, 1>}, {transform_indices = @transform_7, window_bounds = array<i64: 16, 1>}]} {
    %c0_i32 = arith.constant 0 : i32
    %0 = arith.cmpi eq, %arg1, %c0_i32 : i32
    %1 = arith.extui %0 : i1 to i32
    %c0_i32_0 = arith.constant 0 : i32
    %2 = arith.cmpi ne, %1, %c0_i32_0 : i32
    scf.if %2 {
      %c0_17 = arith.constant 0 : index
      %c0_18 = arith.constant 0 : index
      %17 = vector.load %arg4[%c0_17, %c0_18] : memref<1x384xf32, #tpu.memory_space<vmem>>, vector<1x384xf32>
      %18 = vector.shape_cast %17 : vector<1x384xf32> to vector<1x384xf32>
      %19 = vector.broadcast %18 : vector<1x384xf32> to vector<16x384xf32>
      %c0_19 = arith.constant 0 : index
      %c0_20 = arith.constant 0 : index
      %20 = vector.load %arg10[%c0_19, %c0_20] : memref<16x384xf32, #tpu.memory_space<vmem>>, vector<16x384xf32>
      tpu.vector_store %arg10[%c0_19, %c0_20], %19 {strides = array<i32>} : memref<16x384xf32, #tpu.memory_space<vmem>>, vector<16x384xf32>,
      %c0_21 = arith.constant 0 : index
      %c0_22 = arith.constant 0 : index
      %21 = vector.load %arg6[%c0_21, %c0_22] : memref<1x384xf32, #tpu.memory_space<vmem>>, vector<1x384xf32>
      %22 = vector.shape_cast %21 : vector<1x384xf32> to vector<1x384xf32>
      %23 = vector.broadcast %22 : vector<1x384xf32> to vector<16x384xf32>
      %c0_23 = arith.constant 0 : index
      %c0_24 = arith.constant 0 : index
      %24 = vector.load %arg11[%c0_23, %c0_24] : memref<16x384xf32, #tpu.memory_space<vmem>>, vector<16x384xf32>
      tpu.vector_store %arg11[%c0_23, %c0_24], %23 {strides = array<i32>} : memref<16x384xf32, #tpu.memory_space<vmem>>, vector<16x384xf32>,
    } else {
    }
    %c0 = arith.constant 0 : index
    %c0_1 = arith.constant 0 : index
    %3 = vector.load %arg2[%c0, %c0_1] : memref<16x512xf32, #tpu.memory_space<vmem>>, vector<16x512xf32>
    %c0_2 = arith.constant 0 : index
    %c0_3 = arith.constant 0 : index
    %4 = vector.load %arg10[%c0_2, %c0_3] : memref<16x384xf32, #tpu.memory_space<vmem>>, vector<16x384xf32>
    %c0_4 = arith.constant 0 : index
    %c0_5 = arith.constant 0 : index
    %5 = vector.load %arg3[%c0_4, %c0_5] : memref<512x384xf32, #tpu.memory_space<vmem>>, vector<512x384xf32>
    %cst = arith.constant dense<0.000000e+00> : vector<16x384xf32>
    %6 = tpu.matmul %3, %5, %cst {dimension_numbers = #tpu.dot_dimension_numbers<[1], [0], [0], [1], [0, 0, 1, 1], [], []>} : vector<16x512xf32>, vector<512x384xf32>, vector<16x384xf32> -> vector<16x384xf32>
    %7 = arith.addf %4, %6 : vector<16x384xf32>
    %c0_6 = arith.constant 0 : index
    %c0_7 = arith.constant 0 : index
    %8 = vector.load %arg10[%c0_6, %c0_7] : memref<16x384xf32, #tpu.memory_space<vmem>>, vector<16x384xf32>
    tpu.vector_store %arg10[%c0_6, %c0_7], %7 {strides = array<i32>} : memref<16x384xf32, #tpu.memory_space<vmem>>, vector<16x384xf32>,
    %c0_8 = arith.constant 0 : index
    %c0_9 = arith.constant 0 : index
    %9 = vector.load %arg11[%c0_8, %c0_9] : memref<16x384xf32, #tpu.memory_space<vmem>>, vector<16x384xf32>
    %c0_10 = arith.constant 0 : index
    %c0_11 = arith.constant 0 : index
    %10 = vector.load %arg5[%c0_10, %c0_11] : memref<512x384xf32, #tpu.memory_space<vmem>>, vector<512x384xf32>
    %cst_12 = arith.constant dense<0.000000e+00> : vector<16x384xf32>
    %11 = tpu.matmul %3, %10, %cst_12 {dimension_numbers = #tpu.dot_dimension_numbers<[1], [0], [0], [1], [0, 0, 1, 1], [], []>} : vector<16x512xf32>, vector<512x384xf32>, vector<16x384xf32> -> vector<16x384xf32>
    %12 = arith.addf %9, %11 : vector<16x384xf32>
    %c0_13 = arith.constant 0 : index
    %c0_14 = arith.constant 0 : index
    %13 = vector.load %arg11[%c0_13, %c0_14] : memref<16x384xf32, #tpu.memory_space<vmem>>, vector<16x384xf32>
    tpu.vector_store %arg11[%c0_13, %c0_14], %12 {strides = array<i32>} : memref<16x384xf32, #tpu.memory_space<vmem>>, vector<16x384xf32>,
    %c0_i32_15 = arith.constant 0 : i32
    %14 = arith.cmpi eq, %arg1, %c0_i32_15 : i32
    %15 = arith.extui %14 : i1 to i32
    %c0_i32_16 = arith.constant 0 : i32
    %16 = arith.cmpi ne, %15, %c0_i32_16 : i32
    scf.if %16 {
      %c0_17 = arith.constant 0 : index
      %c0_18 = arith.constant 0 : index
      %17 = vector.load %arg10[%c0_17, %c0_18] : memref<16x384xf32, #tpu.memory_space<vmem>>, vector<16x384xf32>
      %18 = math.tanh %17 : vector<16x384xf32>
      %c0_19 = arith.constant 0 : index
      %c0_20 = arith.constant 0 : index
      %19 = vector.load %arg11[%c0_19, %c0_20] : memref<16x384xf32, #tpu.memory_space<vmem>>, vector<16x384xf32>
      %20 = arith.negf %19 : vector<16x384xf32>
      %21 = math.exp %20 : vector<16x384xf32>
      %cst_21 = arith.constant 1.000000e+00 : f32
      %22 = vector.broadcast %cst_21 : f32 to vector<16x384xf32>
      %23 = arith.addf %22, %21 : vector<16x384xf32>
      %24 = arith.divf %22, %23 : vector<16x384xf32>
      %25 = arith.mulf %18, %24 : vector<16x384xf32>
      %c0_22 = arith.constant 0 : index
      %c0_23 = arith.constant 0 : index
      %26 = vector.load %arg7[%c0_22, %c0_23] : memref<1x384xf32, #tpu.memory_space<vmem>>, vector<1x384xf32>
      %27 = vector.broadcast %26 : vector<1x384xf32> to vector<16x384xf32>
      %28 = arith.mulf %25, %27 : vector<16x384xf32>
      %cst_24 = arith.constant dense<0.000000e+00> : vector<16xf32>
      %29 = vector.multi_reduction <add>, %28, %cst_24 [1] : vector<16x384xf32> to vector<16xf32>
      %30 = vector.shape_cast %29 : vector<16xf32> to vector<16x1xf32>
      %c0_25 = arith.constant 0 : index
      %c0_26 = arith.constant 0 : index
      %31 = vector.load %arg8[%c0_25, %c0_26] : memref<1x1xf32, #tpu.memory_space<vmem>>, vector<1x1xf32>
      %32 = vector.broadcast %31 : vector<1x1xf32> to vector<16x1xf32>
      %33 = arith.addf %30, %32 : vector<16x1xf32>
      %c0_27 = arith.constant 0 : index
      %c0_28 = arith.constant 0 : index
      %34 = vector.load %arg9[%c0_27, %c0_28] : memref<16x1xf32, #tpu.memory_space<vmem>>, vector<16x1xf32>
      tpu.vector_store %arg9[%c0_27, %c0_28], %33 {strides = array<i32>} : memref<16x1xf32, #tpu.memory_space<vmem>>, vector<16x1xf32>,
    } else {
    }
    return
  }
  func.func @transform_0(%arg0: i32, %arg1: i32) -> (i32, i32) {
    %c0_i32 = arith.constant 0 : i32
    return %arg0, %arg1 : i32, i32
  }
  func.func @transform_1(%arg0: i32, %arg1: i32) -> (i32, i32) {
    %c0_i32 = arith.constant 0 : i32
    %c0_i32_0 = arith.constant 0 : i32
    return %arg1, %c0_i32 : i32, i32
  }
  func.func @transform_2(%arg0: i32, %arg1: i32) -> (i32, i32) {
    %c0_i32 = arith.constant 0 : i32
    %c0_i32_0 = arith.constant 0 : i32
    %c0_i32_1 = arith.constant 0 : i32
    return %c0_i32, %c0_i32_0 : i32, i32
  }
  func.func @transform_3(%arg0: i32, %arg1: i32) -> (i32, i32) {
    %c0_i32 = arith.constant 0 : i32
    %c0_i32_0 = arith.constant 0 : i32
    return %arg1, %c0_i32 : i32, i32
  }
  func.func @transform_4(%arg0: i32, %arg1: i32) -> (i32, i32) {
    %c0_i32 = arith.constant 0 : i32
    %c0_i32_0 = arith.constant 0 : i32
    %c0_i32_1 = arith.constant 0 : i32
    return %c0_i32, %c0_i32_0 : i32, i32
  }
  func.func @transform_5(%arg0: i32, %arg1: i32) -> (i32, i32) {
    %c0_i32 = arith.constant 0 : i32
    %c0_i32_0 = arith.constant 0 : i32
    %c0_i32_1 = arith.constant 0 : i32
    return %c0_i32, %c0_i32_0 : i32, i32
  }
  func.func @transform_6(%arg0: i32, %arg1: i32) -> (i32, i32) {
    %c0_i32 = arith.constant 0 : i32
    %c0_i32_0 = arith.constant 0 : i32
    %c0_i32_1 = arith.constant 0 : i32
    return %c0_i32, %c0_i32_0 : i32, i32
  }
  func.func @transform_7(%arg0: i32, %arg1: i32) -> (i32, i32) {
    %c0_i32 = arith.constant 0 : i32
    %c0_i32_0 = arith.constant 0 : i32
    return %arg0, %c0_i32 : i32, i32
  }
}

</mosaic_0001>

<bundles_post_ra>
// kernel: tpu_custom_call.1
= control target key start
LH: loop header
LB: loop body
LE: loop exit
PB: predicated region body
PF: predicated region fallthrough
CT: control target
= control target key end

     0   :  { %s2102_s0 = inlined_call_operand.hbm [shape: f32[16,512], index: 0, kind: input, shape index: {}]   ;;  %s2103_s1 = inlined_call_operand.hbm [shape: f32[512,384], index: 1, kind: input, shape index: {}]   ;;  %s2104_s2 = inlined_call_operand.vmem [shape: f32[1,384], index: 2, kind: input, shape index: {}]   ;;  %s2105_s3 = inlined_call_operand.hbm [shape: f32[512,384], index: 3, kind: input, shape index: {}]   ;;  %s2106_s4 = inlined_call_operand.vmem [shape: f32[1,384], index: 4, kind: input, shape index: {}]   ;;  %s2107_s5 = inlined_call_operand.vmem [shape: f32[1,384], index: 5, kind: input, shape index: {}]   ;;  %s2108_s6 = inlined_call_operand.<no memory space> [shape: f32[1,1], index: 6, kind: input, shape index: {}]   ;;  %s2109_s7 = inlined_call_operand.vmem [shape: f32[16,1], index: 7, kind: output, shape index: {}]  }
   0x1   :  { %v12_v0 = vstv %s2108_s6 }
   0x2   :  { %13 = vst [vmem:[#allocation4] sm:$0x1] %v12_v0 }
   0x3   :  { %14 = vsyncpa [#allocation6], 0 }
   0x4   :  { %15 = vsyncpa [#allocation8], 0  ;;  %s1937_s26 = smov [#allocation7]   ;;  %s1867_s30 = scalar_lea.hbm %s2103_s1, 24576 }
   0x5   :  { %s33_s27 = sshll.u32 %s1937_s26, 4  ;;  %p1868_p0 = scmp.ne.s32.totalorder %s2103_s1, %s1867_s30  ;;  %s34_s27 = int_to_ptr.vmem [resolvable:$true] %s33_s27 }
   0x6   :  { %p1871_p1 = scmp.lt.u32.totalorder %s1867_s30, %s2103_s1 }
   0x8   :  { %p1873_p2 = pnand %p1871_p1, %p1868_p0 }
   0xa   :  { %1876 = shalt.err (!%p1873_p2)
}
   0xb   :  { %s1877_s6 = scalar_lea.vmem %s34_s27, 24576  ;;  %p1882_p4 = scmp.lt.s32.totalorder %s34_s27, %s34_s27 }
   0xc   :  { %p1878_p3 = scmp.ne.s32.totalorder %s34_s27, %s1877_s6  ;;  %p1883_p5 = scmp.lt.s32.totalorder %s1877_s6, %s1877_s6 }
   0xe   :  { %p1884_p6 = por %p1883_p5, %p1882_p4 }
  0x10   :  { %p1885_p7 = pnand %p1884_p6, %p1878_p3 }
  0x12   :  { %1888 = shalt.err (!%p1885_p7)
}
  0x13   :  { %s1938_s12 = smov 384   ;;  %s1939_s13 = smov 24  }
  0x14   :  { %39 = dma.hbm_to_vmem [thread:$0]  %s2103_s1, 24576, %s34_s27, [#allocation8], %s1938_s12, %s1938_s12, %s1939_s13  }
  0x15   :  { %s1940_s16 = smov [#allocation5]   ;;  %s1889_s20 = scalar_lea.hbm %s2102_s0, 1024 }
  0x16   :  { %s21_s17 = sshll.u32 %s1940_s16, 4  ;;  %p1890_p8 = scmp.ne.s32.totalorder %s2102_s0, %s1889_s20  ;;  %s22_s17 = int_to_ptr.vmem [resolvable:$true] %s21_s17 }
  0x17   :  { %p1893_p9 = scmp.lt.u32.totalorder %s1889_s20, %s2102_s0 }
  0x19   :  { %p1895_p10 = pnand %p1893_p9, %p1890_p8 }
  0x1b   :  { %1898 = shalt.err (!%p1895_p10)
}
  0x1c   :  { %s1899_s25 = scalar_lea.vmem %s22_s17, 1024  ;;  %p1904_p12 = scmp.lt.s32.totalorder %s22_s17, %s22_s17 }
  0x1d   :  { %p1900_p11 = scmp.ne.s32.totalorder %s22_s17, %s1899_s25  ;;  %p1905_p13 = scmp.lt.s32.totalorder %s1899_s25, %s1899_s25 }
  0x1f   :  { %p1906_p0 = por %p1905_p13, %p1904_p12 }
  0x21   :  { %p1907_p1 = pnand %p1906_p0, %p1900_p11 }
  0x23   :  { %1910 = shalt.err (!%p1907_p1)
}
  0x24   :  { %s1941_s1 = smov 512   ;;  %s1942_s26 = smov 32  }
  0x25   :  { %27 = dma.hbm_to_vmem [thread:$0]  %s2102_s0, 1024, %s22_s17, [#allocation6], %s1941_s1, %s1941_s1, %s1942_s26  }
  0x26   :  { %s1943_s29 = smov [#allocation9]   ;;  %s1911_s10 = scalar_lea.hbm %s2105_s3, 24576 }
  0x27   :  { %s47_s30 = sshll.u32 %s1943_s29, 4  ;;  %p1912_p2 = scmp.ne.s32.totalorder %s2105_s3, %s1911_s10  ;;  %s48_s30 = int_to_ptr.vmem [resolvable:$true] %s47_s30 }
  0x28   :  { %p1915_p3 = scmp.lt.u32.totalorder %s1911_s10, %s2105_s3 }
  0x2a   :  { %p1917_p4 = pnand %p1915_p3, %p1912_p2 }
  0x2c   :  { %1920 = shalt.err (!%p1917_p4)
}
  0x2d   :  { %s1921_s16 = scalar_lea.vmem %s48_s30, 24576  ;;  %p1926_p6 = scmp.lt.s32.totalorder %s48_s30, %s48_s30 }
  0x2e   :  { %p1922_p5 = scmp.ne.s32.totalorder %s48_s30, %s1921_s16  ;;  %p1927_p7 = scmp.lt.s32.totalorder %s1921_s16, %s1921_s16 }
  0x30   :  { %p1928_p8 = por %p1927_p7, %p1926_p6 }
  0x32   :  { %p1929_p9 = pnand %p1928_p8, %p1922_p5 }
  0x34   :  { %1932 = shalt.err (!%p1929_p9)
}
  0x35   :  { %53 = dma.hbm_to_vmem [thread:$0]  %s2105_s3, 24576, %s48_s30, [#allocation8], %s1938_s12, %s1938_s12, %s1939_s13  }
  0x36   :  { %1933 = dma.done.wait [#allocation6], 1024  }
  0x37   :  { %1934 = vsyncadd [#allocation6], 4294966272 }
  0x38   :  { %1935 = dma.done.wait [#allocation8], 49152  }
  0x39   :  { %1936 = vsyncadd [#allocation8], 4294918144  ;;  %v134_v1 = vld [vmem:[#allocation7 + $0x8] sm:$0xff]  ;;  %v137_v2 = vld [vmem:[#allocation7 + $0x20] sm:$0xff]  ;;  %vm1258_vm0 = vcmask 7168  }
  0x3a   :  { %v183_v3 = vld [vmem:[#allocation7 + $0x190] sm:$0xff]  ;;  %v1426_v4 = vpack.c.bf16 %v137_v2, %v134_v1  ;;  %v186_v5 = vld [vmem:[#allocation7 + $0x1a8] sm:$0xff]  ;;  %v133_v6 = vld [vmem:[#allocation7] sm:$0xff] }
  0x3b   :  { %v136_v7 = vld [vmem:[#allocation7 + $0x18] sm:$0xff]  ;;  %v1554_v8 = vpack.c.bf16 %v186_v5, %v183_v3  ;;  %v135_v10 = vld [vmem:[#allocation7 + $0x10] sm:$0xff]  ;;  %v138_v11 = vld [vmem:[#allocation7 + $0x28] sm:$0xff] }
  0x3c   :  { %v1428_v9 = vpack.c.bf16 %v136_v7, %v133_v6  ;;  %v140_v12 = vld [vmem:[#allocation7 + $0x38] sm:$0xff]  ;;  %1427 = vmatprep.subr.bf16.mxu0 %v1426_v4  ;;  %v1556_v13 = vpack.c.bf16 %v138_v11, %v135_v10  ;;  %v143_v14 = vld [vmem:[#allocation7 + $0x50] sm:$0xff]  ;;  %v189_v15 = vld [vmem:[#allocation7 + $0x1c0] sm:$0xff] }
  0x3d   :  { %v192_v16 = vld [vmem:[#allocation7 + $0x1d8] sm:$0xff]  ;;  %1555 = vmatprep.subr.bf16.mxu1 %v1554_v8  ;;  %v1430_v17 = vpack.c.bf16 %v143_v14, %v140_v12  ;;  %v139_v19 = vld [vmem:[#allocation7 + $0x30] sm:$0xff]  ;;  %v142_v20 = vld [vmem:[#allocation7 + $0x48] sm:$0xff] }
  0x3e   :  { %1429 = vmatpush1.bf16.msra.mxu0 %v1428_v9  ;;  %v1558_v18 = vpack.c.bf16 %v192_v16, %v189_v15  ;;  %v141_v21 = vld [vmem:[#allocation7 + $0x40] sm:$0xff]  ;;  %1557 = vmatpush3.bf16.msra.mxu1 %v1556_v13  ;;  %v1432_v22 = vpack.c.bf16 %v142_v20, %v139_v19  ;;  %v144_v23 = vld [vmem:[#allocation7 + $0x58] sm:$0xff]  ;;  %v146_v24 = vld [vmem:[#allocation7 + $0x68] sm:$0xff] }
  0x3f   :  { %v149_v25 = vld [vmem:[#allocation7 + $0x80] sm:$0xff]  ;;  %1431 = vmatprep.subr.bf16.mxu0 %v1430_v17  ;;  %v1560_v26 = vpack.c.bf16 %v144_v23, %v141_v21  ;;  %v195_v28 = vld [vmem:[#allocation7 + $0x1f0] sm:$0xff]  ;;  %v198_v29 = vld [vmem:[#allocation7 + $0x208] sm:$0xff] }
  0x40   :  { %1559 = vmatprep.subr.bf16.mxu1 %v1558_v18  ;;  %v1434_v27 = vpack.c.bf16 %v149_v25, %v146_v24  ;;  %v145_v30 = vld [vmem:[#allocation7 + $0x60] sm:$0xff]  ;;  %v1562_v31 = vpack.c.bf16 %v198_v29, %v195_v28  ;;  %v148_v32 = vld [vmem:[#allocation7 + $0x78] sm:$0xff]  ;;  %v147_v33 = vld [vmem:[#allocation7 + $0x70] sm:$0xff] }
  0x41   :  { %v150_v34 = vld [vmem:[#allocation7 + $0x88] sm:$0xff]  ;;  %v1436_v35 = vpack.c.bf16 %v148_v32, %v145_v30  ;;  %v152_v36 = vld [vmem:[#allocation7 + $0x98] sm:$0xff]  ;;  %v155_v37 = vld [vmem:[#allocation7 + $0xb0] sm:$0xff] }
  0x42   :  { %1433 = vmatpush1.bf16.msra.mxu0 %v1432_v22  ;;  %v201_v38 = vld [vmem:[#allocation7 + $0x220] sm:$0xff]  ;;  %1561 = vmatpush3.bf16.msra.mxu1 %v1560_v26  ;;  %v1564_v39 = vpack.c.bf16 %v150_v34, %v147_v33  ;;  %v1438_v40 = vpack.c.bf16 %v155_v37, %v152_v36  ;;  %v204_v41 = vld [vmem:[#allocation7 + $0x238] sm:$0xff]  ;;  %v151_v42 = vld [vmem:[#allocation7 + $0x90] sm:$0xff] }
  0x43   :  { %1435 = vmatprep.subr.bf16.mxu0 %v1434_v27  ;;  %v154_v43 = vld [vmem:[#allocation7 + $0xa8] sm:$0xff]  ;;  %1563 = vmatprep.subr.bf16.mxu1 %v1562_v31  ;;  %v1566_v44 = vpack.c.bf16 %v204_v41, %v201_v38  ;;  %v153_v45 = vld [vmem:[#allocation7 + $0xa0] sm:$0xff]  ;;  %v156_v46 = vld [vmem:[#allocation7 + $0xb8] sm:$0xff] }
  0x44   :  { %v158_v47 = vld [vmem:[#allocation7 + $0xc8] sm:$0xff]  ;;  %v161_v48 = vld [vmem:[#allocation7 + $0xe0] sm:$0xff]  ;;  %v207_v49 = vld [vmem:[#allocation7 + $0x250] sm:$0xff]  ;;  %v1440_v51 = vpack.c.bf16 %v154_v43, %v151_v42  ;;  %v1568_v52 = vpack.c.bf16 %v156_v46, %v153_v45 }
  0x45   :  { %v210_v50 = vld [vmem:[#allocation7 + $0x268] sm:$0xff]  ;;  %v1442_v53 = vpack.c.bf16 %v161_v48, %v158_v47  ;;  %v157_v54 = vld [vmem:[#allocation7 + $0xc0] sm:$0xff]  ;;  %v160_v55 = vld [vmem:[#allocation7 + $0xd8] sm:$0xff] }
  0x46   :  { %1437 = vmatpush1.bf16.msra.mxu0 %v1436_v35  ;;  %1565 = vmatpush3.bf16.msra.mxu1 %v1564_v39  ;;  %v159_v56 = vld [vmem:[#allocation7 + $0xd0] sm:$0xff]  ;;  %v1570_v57 = vpack.c.bf16 %v210_v50, %v207_v49  ;;  %v162_v58 = vld [vmem:[#allocation7 + $0xe8] sm:$0xff]  ;;  %v164_v59 = vld [vmem:[#allocation7 + $0xf8] sm:$0xff]  ;;  %v1444_v63 = vpack.c.bf16 %v160_v55, %v157_v54 }
  0x47   :  { %1439 = vmatprep.subr.bf16.mxu0 %v1438_v40  ;;  %1567 = vmatprep.subr.bf16.mxu1 %v1566_v44  ;;  %v167_v60 = vld [vmem:[#allocation7 + $0x110] sm:$0xff]  ;;  %v213_v61 = vld [vmem:[#allocation7 + $0x280] sm:$0xff]  ;;  %v216_v62 = vld [vmem:[#allocation7 + $0x298] sm:$0xff]  ;;  %v1572_v0 = vpack.c.bf16 %v162_v58, %v159_v56 }
  0x48   :  { %v1446_v1 = vpack.c.bf16 %v167_v60, %v164_v59  ;;  %v163_v2 = vld [vmem:[#allocation7 + $0xf0] sm:$0xff]  ;;  %v166_v3 = vld [vmem:[#allocation7 + $0x108] sm:$0xff]  ;;  %v165_v4 = vld [vmem:[#allocation7 + $0x100] sm:$0xff]  ;;  %v1574_v5 = vpack.c.bf16 %v216_v62, %v213_v61 }
  0x49   :  { %v168_v6 = vld [vmem:[#allocation7 + $0x118] sm:$0xff]  ;;  %v170_v7 = vld [vmem:[#allocation7 + $0x128] sm:$0xff]  ;;  %v173_v8 = vld [vmem:[#allocation7 + $0x140] sm:$0xff]  ;;  %v1448_v11 = vpack.c.bf16 %v166_v3, %v163_v2 }
  0x4a   :  { %1441 = vmatpush1.bf16.msra.mxu0 %v1440_v51  ;;  %1569 = vmatpush3.bf16.msra.mxu1 %v1568_v52  ;;  %v219_v9 = vld [vmem:[#allocation7 + $0x2b0] sm:$0xff]  ;;  %v222_v10 = vld [vmem:[#allocation7 + $0x2c8] sm:$0xff]  ;;  %v169_v12 = vld [vmem:[#allocation7 + $0x120] sm:$0xff]  ;;  %v1576_v13 = vpack.c.bf16 %v168_v6, %v165_v4  ;;  %v1450_v14 = vpack.c.bf16 %v173_v8, %v170_v7 }
  0x4b   :  { %1443 = vmatprep.subr.bf16.mxu0 %v1442_v53  ;;  %1571 = vmatprep.subr.bf16.mxu1 %v1570_v57  ;;  %v172_v15 = vld [vmem:[#allocation7 + $0x138] sm:$0xff]  ;;  %v171_v16 = vld [vmem:[#allocation7 + $0x130] sm:$0xff]  ;;  %v174_v17 = vld [vmem:[#allocation7 + $0x148] sm:$0xff]  ;;  %v1578_v18 = vpack.c.bf16 %v222_v10, %v219_v9 }
  0x4c   :  { %v176_v19 = vld [vmem:[#allocation7 + $0x158] sm:$0xff]  ;;  %v179_v20 = vld [vmem:[#allocation7 + $0x170] sm:$0xff]  ;;  %v2029_v21 = vld [vmem:[#allocation5 + $0x8] sm:$0xff]  ;;  %v1452_v24 = vpack.c.bf16 %v172_v15, %v169_v12  ;;  %v1580_v25 = vpack.c.bf16 %v174_v17, %v171_v16 }
  0x4d   :  { %v225_v22 = vld [vmem:[#allocation7 + $0x2e0] sm:$0xff]  ;;  %v228_v23 = vld [vmem:[#allocation7 + $0x2f8] sm:$0xff]  ;;  %543 = vmatprep.mubr.f32.mxu1 %v2029_v21  ;;  %389 = vmatprep.mubr.f32.mxu0 %v2029_v21  ;;  %v1454_v26 = vpack.c.bf16 %v179_v20, %v176_v19  ;;  %v175_v27 = vld [vmem:[#allocation7 + $0x150] sm:$0xff] }
  0x4e   :  { %1445 = vmatpush1.bf16.msra.mxu0 %v1444_v63  ;;  %1573 = vmatpush3.bf16.msra.mxu1 %v1572_v0  ;;  %v178_v28 = vld [vmem:[#allocation7 + $0x168] sm:$0xff]  ;;  %v177_v29 = vld [vmem:[#allocation7 + $0x160] sm:$0xff]  ;;  %v1582_v30 = vpack.c.bf16 %v228_v23, %v225_v22  ;;  %v180_v31 = vld [vmem:[#allocation7 + $0x178] sm:$0xff] }
  0x4f   :  { %1447 = vmatprep.subr.bf16.mxu0 %v1446_v1  ;;  %1575 = vmatprep.subr.bf16.mxu1 %v1574_v5  ;;  %v182_v32 = vld [vmem:[#allocation7 + $0x188] sm:$0xff]  ;;  %v185_v33 = vld [vmem:[#allocation7 + $0x1a0] sm:$0xff]  ;;  %v279_v34 = vld [vmem:[#allocation7 + $0x490] sm:$0xff]  ;;  %v1456_v36 = vpack.c.bf16 %v178_v28, %v175_v27  ;;  %v1584_v37 = vpack.c.bf16 %v180_v31, %v177_v29 }
  0x50   :  { %v282_v35 = vld [vmem:[#allocation7 + $0x4a8] sm:$0xff]  ;;  %v1458_v38 = vpack.c.bf16 %v185_v33, %v182_v32  ;;  %v181_v39 = vld [vmem:[#allocation7 + $0x180] sm:$0xff]  ;;  %v184_v40 = vld [vmem:[#allocation7 + $0x198] sm:$0xff] }
  0x51   :  { %v231_v41 = vld [vmem:[#allocation7 + $0x310] sm:$0xff]  ;;  %v1586_v42 = vpack.c.bf16 %v282_v35, %v279_v34  ;;  %v234_v43 = vld [vmem:[#allocation7 + $0x328] sm:$0xff]  ;;  %v188_v44 = vld [vmem:[#allocation7 + $0x1b8] sm:$0xff]  ;;  %v1460_v48 = vpack.c.bf16 %v184_v40, %v181_v39 }
  0x52   :  { %1449 = vmatpush1.bf16.msra.mxu0 %v1448_v11  ;;  %1577 = vmatpush3.bf16.msra.mxu1 %v1576_v13  ;;  %v191_v45 = vld [vmem:[#allocation7 + $0x1d0] sm:$0xff]  ;;  %v285_v46 = vld [vmem:[#allocation7 + $0x4c0] sm:$0xff]  ;;  %v288_v47 = vld [vmem:[#allocation7 + $0x4d8] sm:$0xff]  ;;  %v1588_v50 = vpack.c.bf16 %v234_v43, %v231_v41 }
  0x53   :  { %1451 = vmatprep.subr.bf16.mxu0 %v1450_v14  ;;  %1579 = vmatprep.subr.bf16.mxu1 %v1578_v18  ;;  %v2033_v49 = vld [vmem:[#allocation5] sm:$0xff]  ;;  %v1462_v51 = vpack.c.bf16 %v191_v45, %v188_v44  ;;  %v187_v52 = vld [vmem:[#allocation7 + $0x1b0] sm:$0xff]  ;;  %v190_v53 = vld [vmem:[#allocation7 + $0x1c8] sm:$0xff]  ;;  %v1590_v55 = vpack.c.bf16 %v288_v47, %v285_v46 }
  0x54   :  { %v237_v54 = vld [vmem:[#allocation7 + $0x340] sm:$0xff]  ;;  %v240_v56 = vld [vmem:[#allocation7 + $0x358] sm:$0xff]  ;;  %v194_v57 = vld [vmem:[#allocation7 + $0x1e8] sm:$0xff]  ;;  %v1464_v61 = vpack.c.bf16 %v190_v53, %v187_v52 }
  0x55   :  { %v197_v58 = vld [vmem:[#allocation7 + $0x200] sm:$0xff]  ;;  %v291_v59 = vld [vmem:[#allocation7 + $0x4f0] sm:$0xff]  ;;  %v294_v60 = vld [vmem:[#allocation7 + $0x508] sm:$0xff]  ;;  %v1592_v62 = vpack.c.bf16 %v240_v56, %v237_v54 }
  0x56   :  { %1453 = vmatpush1.bf16.msra.mxu0 %v1452_v24  ;;  %1581 = vmatpush3.bf16.msra.mxu1 %v1580_v25  ;;  %v1466_v63 = vpack.c.bf16 %v197_v58, %v194_v57  ;;  %v193_v0 = vld [vmem:[#allocation7 + $0x1e0] sm:$0xff]  ;;  %v196_v1 = vld [vmem:[#allocation7 + $0x1f8] sm:$0xff]  ;;  %v243_v2 = vld [vmem:[#allocation7 + $0x370] sm:$0xff]  ;;  %v1594_v3 = vpack.c.bf16 %v294_v60, %v291_v59 }
  0x57   :  { %1455 = vmatprep.subr.bf16.mxu0 %v1454_v26  ;;  %1583 = vmatprep.subr.bf16.mxu1 %v1582_v30  ;;  %v246_v4 = vld [vmem:[#allocation7 + $0x388] sm:$0xff]  ;;  %v200_v5 = vld [vmem:[#allocation7 + $0x218] sm:$0xff]  ;;  %v203_v6 = vld [vmem:[#allocation7 + $0x230] sm:$0xff]  ;;  %v1468_v9 = vpack.c.bf16 %v196_v1, %v193_v0 }
  0x58   :  { %v297_v7 = vld [vmem:[#allocation7 + $0x520] sm:$0xff]  ;;  %v300_v8 = vld [vmem:[#allocation7 + $0x538] sm:$0xff]  ;;  %v199_v10 = vld [vmem:[#allocation7 + $0x210] sm:$0xff]  ;;  %v1596_v12 = vpack.c.bf16 %v246_v4, %v243_v2  ;;  %v1470_v13 = vpack.c.bf16 %v203_v6, %v200_v5 }
  0x59   :  { %v2036_v11 = vld [vmem:[#allocation5 + $0x28] sm:$0xff]  ;;  %v249_v15 = vld [vmem:[#allocation7 + $0x3a0] sm:$0xff]  ;;  %v1598_v17 = vpack.c.bf16 %v300_v8, %v297_v7  ;;  %v252_v18 = vld [vmem:[#allocation7 + $0x3b8] sm:$0xff] }
  0x5a   :  { %1457 = vmatpush1.bf16.msra.mxu0 %v1456_v36  ;;  %1585 = vmatpush3.bf16.msra.mxu1 %v1584_v37  ;;  %v202_v14 = vld [vmem:[#allocation7 + $0x228] sm:$0xff]  ;;  %v2038_v16 = vld [vmem:[#allocation5 + $0x20] sm:$0xff]  ;;  %v303_v22 = vld [vmem:[#allocation7 + $0x550] sm:$0xff]  ;;  %v1600_v26 = vpack.c.bf16 %v252_v18, %v249_v15 }
  0x5b   :  { %1459 = vmatprep.subr.bf16.mxu0 %v1458_v38  ;;  %1587 = vmatprep.subr.bf16.mxu1 %v1586_v42  ;;  %v206_v19 = vld [vmem:[#allocation7 + $0x248] sm:$0xff]  ;;  %v209_v20 = vld [vmem:[#allocation7 + $0x260] sm:$0xff]  ;;  %v1472_v24 = vpack.c.bf16 %v202_v14, %v199_v10  ;;  %v2042_v25 = vld [vmem:[#allocation5 + $0x18] sm:$0xff] }
  0x5c   :  { %v306_v23 = vld [vmem:[#allocation7 + $0x568] sm:$0xff]  ;;  %v1474_v27 = vpack.c.bf16 %v209_v20, %v206_v19  ;;  %v205_v28 = vld [vmem:[#allocation7 + $0x240] sm:$0xff]  ;;  %v208_v29 = vld [vmem:[#allocation7 + $0x258] sm:$0xff] }
  0x5d   :  { %544 = vmatmul.mubr.f32.vlgmr.msra.gmra.mrb[0].mxu1 %v2033_v49  ;;  %v255_v30 = vld [vmem:[#allocation7 + $0x3d0] sm:$0xff]  ;;  %v1602_v31 = vpack.c.bf16 %v306_v23, %v303_v22  ;;  %v258_v32 = vld [vmem:[#allocation7 + $0x3e8] sm:$0xff]  ;;  %v212_v33 = vld [vmem:[#allocation7 + $0x278] sm:$0xff]  ;;  %v1476_v37 = vpack.c.bf16 %v208_v29, %v205_v28 }
  0x5e   :  { %1461 = vmatpush1.bf16.msra.mxu0 %v1460_v48  ;;  %1589 = vmatpush3.bf16.msra.mxu1 %v1588_v50  ;;  %v215_v34 = vld [vmem:[#allocation7 + $0x290] sm:$0xff]  ;;  %v309_v35 = vld [vmem:[#allocation7 + $0x580] sm:$0xff]  ;;  %v312_v36 = vld [vmem:[#allocation7 + $0x598] sm:$0xff]  ;;  %v1604_v38 = vpack.c.bf16 %v258_v32, %v255_v30 }
  0x5f   :  { %1463 = vmatprep.subr.bf16.mxu0 %v1462_v51  ;;  %1591 = vmatprep.subr.bf16.mxu1 %v1590_v55  ;;  %v1478_v39 = vpack.c.bf16 %v215_v34, %v212_v33  ;;  %v211_v40 = vld [vmem:[#allocation7 + $0x270] sm:$0xff]  ;;  %v214_v41 = vld [vmem:[#allocation7 + $0x288] sm:$0xff]  ;;  %v261_v42 = vld [vmem:[#allocation7 + $0x400] sm:$0xff]  ;;  %v1606_v43 = vpack.c.bf16 %v312_v36, %v309_v35 }
  0x60   :  { %548 = vmatprep.mubr.f32.mxu1 %v2036_v11  ;;  %v264_v44 = vld [vmem:[#allocation7 + $0x418] sm:$0xff]  ;;  %v218_v45 = vld [vmem:[#allocation7 + $0x2a8] sm:$0xff]  ;;  %v221_v46 = vld [vmem:[#allocation7 + $0x2c0] sm:$0xff]  ;;  %v1480_v50 = vpack.c.bf16 %v214_v41, %v211_v40 }
  0x61   :  { %549 = vmatmul.mubr.f32.gmra.mrb[2].mxu1 %v2038_v16  ;;  %v315_v47 = vld [vmem:[#allocation7 + $0x5b0] sm:$0xff]  ;;  %v318_v48 = vld [vmem:[#allocation7 + $0x5c8] sm:$0xff]  ;;  %v1608_v51 = vpack.c.bf16 %v264_v44, %v261_v42  ;;  %v1482_v52 = vpack.c.bf16 %v221_v46, %v218_v45  ;;  %v217_v53 = vld [vmem:[#allocation7 + $0x2a0] sm:$0xff] }
  0x62   :  { %1465 = vmatpush1.bf16.msra.mxu0 %v1464_v61  ;;  %1593 = vmatpush3.bf16.msra.mxu1 %v1592_v62  ;;  %v220_v54 = vld [vmem:[#allocation7 + $0x2b8] sm:$0xff]  ;;  %v267_v55 = vld [vmem:[#allocation7 + $0x430] sm:$0xff]  ;;  %v1610_v56 = vpack.c.bf16 %v318_v48, %v315_v47  ;;  %v270_v57 = vld [vmem:[#allocation7 + $0x448] sm:$0xff] }
  0x63   :  { %1467 = vmatprep.subr.bf16.mxu0 %v1466_v63  ;;  %1595 = vmatprep.subr.bf16.mxu1 %v1594_v3  ;;  %v224_v58 = vld [vmem:[#allocation7 + $0x2d8] sm:$0xff]  ;;  %v227_v59 = vld [vmem:[#allocation7 + $0x2f0] sm:$0xff]  ;;  %v321_v60 = vld [vmem:[#allocation7 + $0x5e0] sm:$0xff]  ;;  %v1484_v62 = vpack.c.bf16 %v220_v54, %v217_v53  ;;  %v1612_v63 = vpack.c.bf16 %v270_v57, %v267_v55 }
  0x64   :  { %618 = vmatprep.mubr.f32.mxu1 %v2042_v25  ;;  %v324_v61 = vld [vmem:[#allocation7 + $0x5f8] sm:$0xff]  ;;  %v1486_v0 = vpack.c.bf16 %v227_v59, %v224_v58  ;;  %v223_v1 = vld [vmem:[#allocation7 + $0x2d0] sm:$0xff]  ;;  %v226_v2 = vld [vmem:[#allocation7 + $0x2e8] sm:$0xff] }
  0x65   :  { %v273_v3 = vld [vmem:[#allocation7 + $0x460] sm:$0xff]  ;;  %v1614_v4 = vpack.c.bf16 %v324_v61, %v321_v60  ;;  %v276_v5 = vld [vmem:[#allocation7 + $0x478] sm:$0xff]  ;;  %v230_v6 = vld [vmem:[#allocation7 + $0x308] sm:$0xff]  ;;  %v1488_v10 = vpack.c.bf16 %v226_v2, %v223_v1 }
  0x66   :  { %1469 = vmatpush1.bf16.msra.mxu0 %v1468_v9  ;;  %1597 = vmatpush3.bf16.msra.mxu1 %v1596_v12  ;;  %v233_v7 = vld [vmem:[#allocation7 + $0x320] sm:$0xff]  ;;  %v648_v8 = vld [vmem:[#allocation9 + $0x8] sm:$0xff]  ;;  %v1616_v12 = vpack.c.bf16 %v276_v5, %v273_v3  ;;  %v232_v15 = vld [vmem:[#allocation7 + $0x318] sm:$0xff] }
  0x67   :  { %1471 = vmatprep.subr.bf16.mxu0 %v1470_v13  ;;  %1599 = vmatprep.subr.bf16.mxu1 %v1598_v17  ;;  %v651_v9 = vld [vmem:[#allocation9 + $0x20] sm:$0xff]  ;;  %v1490_v13 = vpack.c.bf16 %v233_v7, %v230_v6  ;;  %v650_v19 = vld [vmem:[#allocation9 + $0x18] sm:$0xff]  ;;  %v239_v22 = vld [vmem:[#allocation7 + $0x350] sm:$0xff] }
  0x68   :  { %v229_v14 = vld [vmem:[#allocation7 + $0x300] sm:$0xff]  ;;  %v1618_v17 = vpack.c.bf16 %v651_v9, %v648_v8  ;;  %v236_v20 = vld [vmem:[#allocation7 + $0x338] sm:$0xff]  ;;  %v235_v30 = vld [vmem:[#allocation7 + $0x330] sm:$0xff] }
  0x69   :  { %v647_v18 = vld [vmem:[#allocation9] sm:$0xff]  ;;  %v654_v23 = vld [vmem:[#allocation9 + $0x38] sm:$0xff]  ;;  %v653_v32 = vld [vmem:[#allocation9 + $0x30] sm:$0xff]  ;;  %v1494_v33 = vpack.c.bf16 %v239_v22, %v236_v20 }
  0x6a   :  { %1473 = vmatpush1.bf16.msra.mxu0 %v1472_v24  ;;  %1601 = vmatpush3.bf16.msra.mxu1 %v1600_v26  ;;  %v657_v24 = vld [vmem:[#allocation9 + $0x50] sm:$0xff]  ;;  %v2047_v28 = vld [vmem:[#allocation5 + $0x38] sm:$0xff]  ;;  %v1620_v29 = vpack.c.bf16 %v650_v19, %v647_v18  ;;  %v656_v35 = vld [vmem:[#allocation9 + $0x48] sm:$0xff] }
  0x6b   :  { %1475 = vmatprep.subr.bf16.mxu0 %v1474_v27  ;;  %1603 = vmatprep.subr.bf16.mxu1 %v1602_v31  ;;  %v2045_v26 = vld [vmem:[#allocation5 + $0x10] sm:$0xff]  ;;  %v1492_v27 = vpack.c.bf16 %v232_v15, %v229_v14  ;;  %v238_v31 = vld [vmem:[#allocation7 + $0x348] sm:$0xff]  ;;  %v1622_v34 = vpack.c.bf16 %v657_v24, %v654_v23  ;;  %v1624_v42 = vpack.c.bf16 %v656_v35, %v653_v32  ;;  %v241_v44 = vld [vmem:[#allocation7 + $0x360] sm:$0xff] }
  0x6c   :  { %v242_v36 = vld [vmem:[#allocation7 + $0x368] sm:$0xff]  ;;  %v2051_v40 = vld [vmem:[#allocation5 + $0x30] sm:$0xff]  ;;  %v1496_v41 = vpack.c.bf16 %v238_v31, %v235_v30  ;;  %v244_v45 = vld [vmem:[#allocation7 + $0x378] sm:$0xff] }
  0x6d   :  { %v659_v46 = vld [vmem:[#allocation9 + $0x60] sm:$0xff]  ;;  %v662_v48 = vld [vmem:[#allocation9 + $0x78] sm:$0xff]  ;;  %v669_v53 = vld [vmem:[#allocation9 + $0xb0] sm:$0xff]  ;;  %v1500_v54 = vpack.c.bf16 %v244_v45, %v241_v44 }
  0x6e   :  { %1477 = vmatpush1.bf16.msra.mxu0 %v1476_v37  ;;  %1605 = vmatpush3.bf16.msra.mxu1 %v1604_v38  ;;  %v245_v37 = vld [vmem:[#allocation7 + $0x380] sm:$0xff]  ;;  %v660_v38 = vld [vmem:[#allocation9 + $0x68] sm:$0xff]  ;;  %v1628_v55 = vpack.c.bf16 %v662_v48, %v659_v46  ;;  %v247_v57 = vld [vmem:[#allocation7 + $0x390] sm:$0xff] }
  0x6f   :  { %1479 = vmatprep.subr.bf16.mxu0 %v1478_v39  ;;  %1607 = vmatprep.subr.bf16.mxu1 %v1606_v43  ;;  %v663_v39 = vld [vmem:[#allocation9 + $0x80] sm:$0xff]  ;;  %v1498_v43 = vpack.c.bf16 %v245_v37, %v242_v36  ;;  %v250_v58 = vld [vmem:[#allocation7 + $0x3a8] sm:$0xff]  ;;  %v665_v59 = vld [vmem:[#allocation9 + $0x90] sm:$0xff] }
  0x70   :  { %v1626_v47 = vpack.c.bf16 %v663_v39, %v660_v38  ;;  %v668_v61 = vld [vmem:[#allocation9 + $0xa8] sm:$0xff]  ;;  %v675_v1 = vld [vmem:[#allocation9 + $0xe0] sm:$0xff]  ;;  %v1504_v2 = vpack.c.bf16 %v250_v58, %v247_v57  ;;  %v256_v6 = vld [vmem:[#allocation7 + $0x3d8] sm:$0xff] }
  0x71   :  { %v1632_v3 = vpack.c.bf16 %v668_v61, %v665_v59  ;;  %v253_v5 = vld [vmem:[#allocation7 + $0x3c0] sm:$0xff]  ;;  %v674_v9 = vld [vmem:[#allocation9 + $0xd8] sm:$0xff]  ;;  %v681_v14 = vld [vmem:[#allocation9 + $0x110] sm:$0xff] }
  0x72   :  { %1481 = vmatpush1.bf16.msra.mxu0 %v1480_v50  ;;  %1609 = vmatpush3.bf16.msra.mxu1 %v1608_v51  ;;  %v248_v50 = vld [vmem:[#allocation7 + $0x398] sm:$0xff]  ;;  %v251_v51 = vld [vmem:[#allocation7 + $0x3b0] sm:$0xff]  ;;  %v671_v7 = vld [vmem:[#allocation9 + $0xc0] sm:$0xff]  ;;  %v1508_v15 = vpack.c.bf16 %v256_v6, %v253_v5 }
  0x73   :  { %1483 = vmatprep.subr.bf16.mxu0 %v1482_v52  ;;  %1611 = vmatprep.subr.bf16.mxu1 %v1610_v56  ;;  %v666_v52 = vld [vmem:[#allocation9 + $0x98] sm:$0xff]  ;;  %v1502_v56 = vpack.c.bf16 %v251_v51, %v248_v50  ;;  %v259_v19 = vld [vmem:[#allocation7 + $0x3f0] sm:$0xff]  ;;  %v262_v20 = vld [vmem:[#allocation7 + $0x408] sm:$0xff] }
  0x74   :  { %v1630_v60 = vpack.c.bf16 %v669_v53, %v666_v52  ;;  %v677_v22 = vld [vmem:[#allocation9 + $0xf0] sm:$0xff]  ;;  %v680_v24 = vld [vmem:[#allocation9 + $0x108] sm:$0xff]  ;;  %v687_v31 = vld [vmem:[#allocation9 + $0x140] sm:$0xff]  ;;  %v1512_v32 = vpack.c.bf16 %v262_v20, %v259_v19 }
  0x75   :  { %v684_v30 = vld [vmem:[#allocation9 + $0x128] sm:$0xff]  ;;  %v265_v35 = vld [vmem:[#allocation7 + $0x420] sm:$0xff]  ;;  %v268_v36 = vld [vmem:[#allocation7 + $0x438] sm:$0xff] }
  0x76   :  { %1485 = vmatpush1.bf16.msra.mxu0 %v1484_v62  ;;  %1613 = vmatpush3.bf16.msra.mxu1 %v1612_v63  ;;  %v254_v62 = vld [vmem:[#allocation7 + $0x3c8] sm:$0xff]  ;;  %v257_v63 = vld [vmem:[#allocation7 + $0x3e0] sm:$0xff]  ;;  %v1642_v38 = vpack.c.bf16 %v687_v31, %v684_v30  ;;  %v686_v39 = vld [vmem:[#allocation9 + $0x138] sm:$0xff]  ;;  %v1516_v45 = vpack.c.bf16 %v268_v36, %v265_v35 }
  0x77   :  { %1487 = vmatprep.subr.bf16.mxu0 %v1486_v0  ;;  %1615 = vmatprep.subr.bf16.mxu1 %v1614_v4  ;;  %v672_v0 = vld [vmem:[#allocation9 + $0xc8] sm:$0xff]  ;;  %v1506_v4 = vpack.c.bf16 %v257_v63, %v254_v62  ;;  %v683_v37 = vld [vmem:[#allocation9 + $0x120] sm:$0xff]  ;;  %v693_v44 = vld [vmem:[#allocation9 + $0x170] sm:$0xff] }
  0x78   :  { %v1634_v8 = vpack.c.bf16 %v675_v1, %v672_v0  ;;  %v1644_v46 = vpack.c.bf16 %v686_v39, %v683_v37  ;;  %v271_v48 = vld [vmem:[#allocation7 + $0x450] sm:$0xff]  ;;  %v274_v50 = vld [vmem:[#allocation7 + $0x468] sm:$0xff]  ;;  %v699_v57 = vld [vmem:[#allocation9 + $0x1a0] sm:$0xff] }
  0x79   :  { %v689_v51 = vld [vmem:[#allocation9 + $0x150] sm:$0xff]  ;;  %v692_v53 = vld [vmem:[#allocation9 + $0x168] sm:$0xff]  ;;  %v1520_v58 = vpack.c.bf16 %v274_v50, %v271_v48  ;;  %v277_v61 = vld [vmem:[#allocation7 + $0x480] sm:$0xff] }
  0x7a   :  { %1489 = vmatpush1.bf16.msra.mxu0 %v1488_v10  ;;  %1617 = vmatpush3.bf16.msra.mxu1 %v1616_v12  ;;  %v260_v10 = vld [vmem:[#allocation7 + $0x3f8] sm:$0xff]  ;;  %v263_v12 = vld [vmem:[#allocation7 + $0x410] sm:$0xff]  ;;  %v1648_v59 = vpack.c.bf16 %v692_v53, %v689_v51  ;;  %v695_v63 = vld [vmem:[#allocation9 + $0x180] sm:$0xff] }
  0x7b   :  { %1491 = vmatprep.subr.bf16.mxu0 %v1490_v13  ;;  %1619 = vmatprep.subr.bf16.mxu1 %v1618_v17  ;;  %v678_v13 = vld [vmem:[#allocation9 + $0xf8] sm:$0xff]  ;;  %v1636_v17 = vpack.c.bf16 %v674_v9, %v671_v7  ;;  %v1510_v18 = vpack.c.bf16 %v263_v12, %v260_v10  ;;  %v705_v5 = vld [vmem:[#allocation9 + $0x1d0] sm:$0xff]  ;;  %v286_v10 = vld [vmem:[#allocation7 + $0x4c8] sm:$0xff] }
  0x7c   :  { %v1638_v23 = vpack.c.bf16 %v681_v14, %v678_v13  ;;  %v280_v62 = vld [vmem:[#allocation7 + $0x498] sm:$0xff]  ;;  %v283_v9 = vld [vmem:[#allocation7 + $0x4b0] sm:$0xff]  ;;  %v704_v14 = vld [vmem:[#allocation9 + $0x1c8] sm:$0xff] }
  0x7d   :  { %390 = vmatmul.mubr.f32.vlgmr.msra.gmra.mrb[0].mxu0 %v2033_v49  ;;  %619 = vmatmul.mubr.f32.vlgmr.msra.gmra.mrb[4].mxu1 %v2045_v26  ;;  %v698_v1 = vld [vmem:[#allocation9 + $0x198] sm:$0xff]  ;;  %v1524_v6 = vpack.c.bf16 %v280_v62, %v277_v61  ;;  %v701_v12 = vld [vmem:[#allocation9 + $0x1b0] sm:$0xff]  ;;  %v711_v19 = vld [vmem:[#allocation9 + $0x200] sm:$0xff]  ;;  %v1528_v20 = vpack.c.bf16 %v286_v10, %v283_v9 }
  0x7e   :  { %1493 = vmatpush1.bf16.msra.mxu0 %v1492_v27  ;;  %1621 = vmatpush1.bf16.msra.mxu1 %v1620_v29  ;;  %v266_v27 = vld [vmem:[#allocation7 + $0x428] sm:$0xff]  ;;  %v269_v29 = vld [vmem:[#allocation7 + $0x440] sm:$0xff]  ;;  %v1652_v7 = vpack.c.bf16 %v698_v1, %v695_v63  ;;  %v710_v31 = vld [vmem:[#allocation9 + $0x1f8] sm:$0xff] }
  0x7f   :  { %623 = vmatprep.mubr.f32.mxu1 %v2047_v28  ;;  %1495 = vmatprep.subr.bf16.mxu0 %v1494_v33  ;;  %v1640_v33 = vpack.c.bf16 %v680_v24, %v677_v22  ;;  %v1656_v22 = vpack.c.bf16 %v704_v14, %v701_v12  ;;  %v289_v24 = vld [vmem:[#allocation7 + $0x4e0] sm:$0xff]  ;;  %v717_v35 = vld [vmem:[#allocation9 + $0x230] sm:$0xff] }
  0x80   :  { %1623 = vmatprep.subr.bf16.mxu1 %v1622_v34  ;;  %395 = vmatprep.mubr.f32.mxu0 %v2036_v11  ;;  %v1514_v34 = vpack.c.bf16 %v269_v29, %v266_v27  ;;  %v292_v27 = vld [vmem:[#allocation7 + $0x4f8] sm:$0xff]  ;;  %v707_v29 = vld [vmem:[#allocation9 + $0x1e0] sm:$0xff]  ;;  %v295_v39 = vld [vmem:[#allocation7 + $0x510] sm:$0xff] }
  0x81   :  { %624 = vmatmul.mubr.f32.gmra.mrb[6].mxu1 %v2051_v40  ;;  %396 = vmatmul.mubr.f32.gmra.mrb[2].mxu0 %v2038_v16  ;;  %v1532_v36 = vpack.c.bf16 %v292_v27, %v289_v24  ;;  %v1660_v37 = vpack.c.bf16 %v710_v31, %v707_v29  ;;  %v723_v48 = vld [vmem:[#allocation9 + $0x260] sm:$0xff]  ;;  %v729_v61 = vld [vmem:[#allocation9 + $0x290] sm:$0xff] }
  0x82   :  { %1497 = vmatpush1.bf16.msra.mxu0 %v1496_v41  ;;  %1625 = vmatpush1.bf16.msra.mxu1 %v1624_v42  ;;  %v272_v41 = vld [vmem:[#allocation7 + $0x458] sm:$0xff]  ;;  %v275_v42 = vld [vmem:[#allocation7 + $0x470] sm:$0xff]  ;;  %v301_v53 = vld [vmem:[#allocation7 + $0x540] sm:$0xff] }
  0x83   :  { %1499 = vmatprep.subr.bf16.mxu0 %v1498_v43  ;;  %1627 = vmatprep.subr.bf16.mxu1 %v1626_v47  ;;  %v690_v43 = vld [vmem:[#allocation9 + $0x158] sm:$0xff]  ;;  %v1518_v47 = vpack.c.bf16 %v275_v42, %v272_v41  ;;  %v298_v41 = vld [vmem:[#allocation7 + $0x528] sm:$0xff]  ;;  %v713_v42 = vld [vmem:[#allocation9 + $0x210] sm:$0xff] }
  0x84   :  { %466 = vmatprep.mubr.f32.mxu0 %v2042_v25  ;;  %903 = vmatprep.mubr.f32.mxu1 %v2029_v21  ;;  %v1646_v52 = vpack.c.bf16 %v693_v44, %v690_v43  ;;  %v716_v44 = vld [vmem:[#allocation9 + $0x228] sm:$0xff]  ;;  %v1536_v50 = vpack.c.bf16 %v298_v41, %v295_v39  ;;  %v307_v1 = vld [vmem:[#allocation7 + $0x570] sm:$0xff]  ;;  %v735_v9 = vld [vmem:[#allocation9 + $0x2c0] sm:$0xff] }
  0x85   :  { %v1664_v51 = vpack.c.bf16 %v716_v44, %v713_v42  ;;  %v313_v14 = vld [vmem:[#allocation7 + $0x5a0] sm:$0xff]  ;;  %v741_v24 = vld [vmem:[#allocation9 + $0x2f0] sm:$0xff] }
  0x86   :  { %1501 = vmatpush1.bf16.msra.mxu0 %v1500_v54  ;;  %1629 = vmatpush1.bf16.msra.mxu1 %v1628_v55  ;;  %v278_v54 = vld [vmem:[#allocation7 + $0x488] sm:$0xff]  ;;  %v281_v55 = vld [vmem:[#allocation7 + $0x4a0] sm:$0xff]  ;;  %v319_v31 = vld [vmem:[#allocation7 + $0x5d0] sm:$0xff] }
  0x87   :  { %1503 = vmatprep.subr.bf16.mxu0 %v1502_v56  ;;  %1631 = vmatprep.subr.bf16.mxu1 %v1630_v60  ;;  %v696_v56 = vld [vmem:[#allocation9 + $0x188] sm:$0xff]  ;;  %v1522_v60 = vpack.c.bf16 %v281_v55, %v278_v54  ;;  %v304_v54 = vld [vmem:[#allocation7 + $0x558] sm:$0xff]  ;;  %v719_v55 = vld [vmem:[#allocation9 + $0x240] sm:$0xff] }
  0x88   :  { %v1650_v0 = vpack.c.bf16 %v699_v57, %v696_v56  ;;  %v722_v57 = vld [vmem:[#allocation9 + $0x258] sm:$0xff]  ;;  %v1540_v62 = vpack.c.bf16 %v304_v54, %v301_v53  ;;  %v747_v39 = vld [vmem:[#allocation9 + $0x320] sm:$0xff]  ;;  %v649_v44 = vld [vmem:[#allocation9 + $0x10] sm:$0xff] }
  0x89   :  { %v1668_v63 = vpack.c.bf16 %v722_v57, %v719_v55  ;;  %v706_v53 = vld [vmem:[#allocation9 + $0x1d8] sm:$0xff]  ;;  %v655_v57 = vld [vmem:[#allocation9 + $0x40] sm:$0xff] }
  0x8a   :  { %1505 = vmatpush1.bf16.msra.mxu0 %v1504_v2  ;;  %1633 = vmatpush1.bf16.msra.mxu1 %v1632_v3  ;;  %v284_v2 = vld [vmem:[#allocation7 + $0x4b8] sm:$0xff]  ;;  %v287_v3 = vld [vmem:[#allocation7 + $0x4d0] sm:$0xff] }
  0x8b   :  { %1507 = vmatprep.subr.bf16.mxu0 %v1506_v4  ;;  %1635 = vmatprep.subr.bf16.mxu1 %v1634_v8  ;;  %v702_v4 = vld [vmem:[#allocation9 + $0x1b8] sm:$0xff]  ;;  %v1526_v8 = vpack.c.bf16 %v287_v3, %v284_v2  ;;  %v310_v2 = vld [vmem:[#allocation7 + $0x588] sm:$0xff]  ;;  %v725_v3 = vld [vmem:[#allocation9 + $0x270] sm:$0xff] }
  0x8c   :  { %v1654_v13 = vpack.c.bf16 %v705_v5, %v702_v4  ;;  %v728_v5 = vld [vmem:[#allocation9 + $0x288] sm:$0xff]  ;;  %v1544_v10 = vpack.c.bf16 %v310_v2, %v307_v1  ;;  %v759_v1 = vld [vmem:[#allocation9 + $0x380] sm:$0xff] }
  0x8d   :  { %v1672_v12 = vpack.c.bf16 %v728_v5, %v725_v3  ;;  %v755_v5 = vld [vmem:[#allocation9 + $0x360] sm:$0xff] }
  0x8e   :  { %1509 = vmatpush1.bf16.msra.mxu0 %v1508_v15  ;;  %1637 = vmatpush1.bf16.msra.mxu1 %v1636_v17  ;;  %v290_v15 = vld [vmem:[#allocation7 + $0x4e8] sm:$0xff]  ;;  %v293_v17 = vld [vmem:[#allocation7 + $0x500] sm:$0xff] }
  0x8f   :  { %1511 = vmatprep.subr.bf16.mxu0 %v1510_v18  ;;  %1639 = vmatprep.subr.bf16.mxu1 %v1638_v23  ;;  %v708_v18 = vld [vmem:[#allocation9 + $0x1e8] sm:$0xff]  ;;  %v1530_v23 = vpack.c.bf16 %v293_v17, %v290_v15  ;;  %v316_v15 = vld [vmem:[#allocation7 + $0x5b8] sm:$0xff]  ;;  %v731_v17 = vld [vmem:[#allocation9 + $0x2a0] sm:$0xff] }
  0x90   :  { %v1658_v30 = vpack.c.bf16 %v711_v19, %v708_v18  ;;  %v734_v19 = vld [vmem:[#allocation9 + $0x2b8] sm:$0xff]  ;;  %v1548_v27 = vpack.c.bf16 %v316_v15, %v313_v14  ;;  %v761_v15 = vld [vmem:[#allocation9 + $0x390] sm:$0xff] }
  0x91   :  { %v1676_v29 = vpack.c.bf16 %v734_v19, %v731_v17  ;;  %v667_v17 = vld [vmem:[#allocation9 + $0xa0] sm:$0xff] }
  0x92   :  { %1513 = vmatpush1.bf16.msra.mxu0 %v1512_v32  ;;  %1641 = vmatpush1.bf16.msra.mxu1 %v1640_v33  ;;  %v296_v32 = vld [vmem:[#allocation7 + $0x518] sm:$0xff]  ;;  %v299_v33 = vld [vmem:[#allocation7 + $0x530] sm:$0xff] }
  0x93   :  { %1515 = vmatprep.subr.bf16.mxu0 %v1514_v34  ;;  %1643 = vmatprep.subr.bf16.mxu1 %v1642_v38  ;;  %v714_v34 = vld [vmem:[#allocation9 + $0x218] sm:$0xff]  ;;  %v1534_v38 = vpack.c.bf16 %v299_v33, %v296_v32  ;;  %v322_v32 = vld [vmem:[#allocation7 + $0x5e8] sm:$0xff]  ;;  %v737_v33 = vld [vmem:[#allocation9 + $0x2d0] sm:$0xff] }
  0x94   :  { %v1662_v43 = vpack.c.bf16 %v717_v35, %v714_v34  ;;  %v740_v35 = vld [vmem:[#allocation9 + $0x2e8] sm:$0xff]  ;;  %v1552_v41 = vpack.c.bf16 %v322_v32, %v319_v31  ;;  %v673_v31 = vld [vmem:[#allocation9 + $0xd0] sm:$0xff] }
  0x95   :  { %v1680_v42 = vpack.c.bf16 %v740_v35, %v737_v33  ;;  %v676_v32 = vld [vmem:[#allocation9 + $0xe8] sm:$0xff]  ;;  %v727_v35 = vld [vmem:[#allocation9 + $0x280] sm:$0xff] }
  0x96   :  { %1517 = vmatpush1.bf16.msra.mxu0 %v1516_v45  ;;  %1645 = vmatpush1.bf16.msra.mxu1 %v1644_v46  ;;  %v302_v45 = vld [vmem:[#allocation7 + $0x548] sm:$0xff]  ;;  %v305_v46 = vld [vmem:[#allocation7 + $0x560] sm:$0xff] }
  0x97   :  { %1519 = vmatprep.subr.bf16.mxu0 %v1518_v47  ;;  %1647 = vmatprep.subr.bf16.mxu1 %v1646_v52  ;;  %v720_v47 = vld [vmem:[#allocation9 + $0x248] sm:$0xff]  ;;  %v1538_v52 = vpack.c.bf16 %v305_v46, %v302_v45 }
  0x98   :  { %v1666_v56 = vpack.c.bf16 %v723_v48, %v720_v47  ;;  %v652_v45 = vld [vmem:[#allocation9 + $0x28] sm:$0xff]  ;;  %v743_v47 = vld [vmem:[#allocation9 + $0x300] sm:$0xff]  ;;  %v746_v48 = vld [vmem:[#allocation9 + $0x318] sm:$0xff] }
  0x99   :  { %v1748_v54 = vpack.c.bf16 %v652_v45, %v649_v44  ;;  %v1684_v55 = vpack.c.bf16 %v746_v48, %v743_v47  ;;  %v776_v45 = vld [vmem:[#allocation9 + $0x408] sm:$0xff] }
  0x9a   :  { %1521 = vmatpush1.bf16.msra.mxu0 %v1520_v58  ;;  %1649 = vmatpush1.bf16.msra.mxu1 %v1648_v59  ;;  %v308_v58 = vld [vmem:[#allocation7 + $0x578] sm:$0xff]  ;;  %v311_v59 = vld [vmem:[#allocation7 + $0x590] sm:$0xff]  ;;  %v736_v47 = vld [vmem:[#allocation9 + $0x2c8] sm:$0xff] }
  0x9b   :  { %1523 = vmatprep.subr.bf16.mxu0 %v1522_v60  ;;  %1651 = vmatprep.subr.bf16.mxu1 %v1650_v0  ;;  %v726_v60 = vld [vmem:[#allocation9 + $0x278] sm:$0xff]  ;;  %v1542_v0 = vpack.c.bf16 %v311_v59, %v308_v58  ;;  %v780_v48 = vld [vmem:[#allocation9 + $0x428] sm:$0xff] }
  0x9c   :  { %v1670_v4 = vpack.c.bf16 %v729_v61, %v726_v60  ;;  %v658_v58 = vld [vmem:[#allocation9 + $0x58] sm:$0xff]  ;;  %v752_v61 = vld [vmem:[#allocation9 + $0x348] sm:$0xff] }
  0x9d   :  { %v1752_v2 = vpack.c.bf16 %v658_v58, %v655_v57  ;;  %v782_v58 = vld [vmem:[#allocation9 + $0x438] sm:$0xff] }
  0x9e   :  { %1525 = vmatpush1.bf16.msra.mxu0 %v1524_v6  ;;  %1653 = vmatpush1.bf16.msra.mxu1 %v1652_v7  ;;  %v314_v6 = vld [vmem:[#allocation7 + $0x5a8] sm:$0xff]  ;;  %v317_v7 = vld [vmem:[#allocation7 + $0x5c0] sm:$0xff] }
  0x9f   :  { %1527 = vmatprep.subr.bf16.mxu0 %v1526_v8  ;;  %1655 = vmatprep.subr.bf16.mxu1 %v1654_v13  ;;  %v732_v8 = vld [vmem:[#allocation9 + $0x2a8] sm:$0xff]  ;;  %v1546_v13 = vpack.c.bf16 %v317_v7, %v314_v6  ;;  %v661_v6 = vld [vmem:[#allocation9 + $0x70] sm:$0xff] }
  0xa0   :  { %v1674_v18 = vpack.c.bf16 %v735_v9, %v732_v8  ;;  %v664_v7 = vld [vmem:[#allocation9 + $0x88] sm:$0xff]  ;;  %v758_v9 = vld [vmem:[#allocation9 + $0x378] sm:$0xff] }
  0xa2   :  { %1529 = vmatpush1.bf16.msra.mxu0 %v1528_v20  ;;  %1657 = vmatpush1.bf16.msra.mxu1 %v1656_v22  ;;  %v320_v20 = vld [vmem:[#allocation7 + $0x5d8] sm:$0xff]  ;;  %v323_v22 = vld [vmem:[#allocation7 + $0x5f0] sm:$0xff] }
  0xa3   :  { %1531 = vmatprep.subr.bf16.mxu0 %v1530_v23  ;;  %1659 = vmatprep.subr.bf16.mxu1 %v1658_v30  ;;  %v738_v23 = vld [vmem:[#allocation9 + $0x2d8] sm:$0xff]  ;;  %v1550_v30 = vpack.c.bf16 %v323_v22, %v320_v20  ;;  %v764_v20 = vld [vmem:[#allocation9 + $0x3a8] sm:$0xff]  ;;  %v721_v22 = vld [vmem:[#allocation9 + $0x250] sm:$0xff] }
  0xa4   :  { %v1678_v34 = vpack.c.bf16 %v741_v24, %v738_v23  ;;  %v724_v23 = vld [vmem:[#allocation9 + $0x268] sm:$0xff] }
  0xa5   :  { %v768_v24 = vld [vmem:[#allocation9 + $0x3c8] sm:$0xff] }
  0xa6   :  { %1533 = vmatpush1.bf16.msra.mxu0 %v1532_v36  ;;  %1661 = vmatpush1.bf16.msra.mxu1 %v1660_v37  ;;  %v697_v36 = vld [vmem:[#allocation9 + $0x190] sm:$0xff]  ;;  %v700_v37 = vld [vmem:[#allocation9 + $0x1a8] sm:$0xff] }
  0xa7   :  { %1535 = vmatprep.subr.bf16.mxu0 %v1534_v38  ;;  %1663 = vmatprep.subr.bf16.mxu1 %v1662_v43  ;;  %v744_v38 = vld [vmem:[#allocation9 + $0x308] sm:$0xff]  ;;  %v1746_v43 = vpack.c.bf16 %v700_v37, %v697_v36  ;;  %v730_v36 = vld [vmem:[#allocation9 + $0x298] sm:$0xff] }
  0xa8   :  { %v1682_v46 = vpack.c.bf16 %v747_v39, %v744_v38  ;;  %v774_v37 = vld [vmem:[#allocation9 + $0x3f8] sm:$0xff]  ;;  %v1764_v38 = vpack.c.bf16 %v676_v32, %v673_v31  ;;  %v1766_v39 = vpack.c.bf16 %v730_v36, %v727_v35  ;;  %v800_v31 = vld [vmem:[#allocation9 + $0x4c8] sm:$0xff]  ;;  %v805_v32 = vld [vmem:[#allocation9 + $0x4f0] sm:$0xff] }
  0xa9   :  { %v804_v35 = vld [vmem:[#allocation9 + $0x4e8] sm:$0xff]  ;;  %v807_v36 = vld [vmem:[#allocation9 + $0x500] sm:$0xff] }
  0xaa   :  { %1537 = vmatpush1.bf16.msra.mxu0 %v1536_v50  ;;  %1665 = vmatpush1.bf16.msra.mxu1 %v1664_v51  ;;  %v750_v50 = vld [vmem:[#allocation9 + $0x338] sm:$0xff]  ;;  %v753_v51 = vld [vmem:[#allocation9 + $0x350] sm:$0xff] }
  0xab   :  { %1539 = vmatprep.subr.bf16.mxu0 %v1538_v52  ;;  %1667 = vmatprep.subr.bf16.mxu1 %v1666_v56  ;;  %v703_v52 = vld [vmem:[#allocation9 + $0x1c0] sm:$0xff]  ;;  %v749_v56 = vld [vmem:[#allocation9 + $0x330] sm:$0xff]  ;;  %v1686_v59 = vpack.c.bf16 %v753_v51, %v750_v50 }
  0xac   :  { %v1750_v60 = vpack.c.bf16 %v706_v53, %v703_v52  ;;  %v1688_v3 = vpack.c.bf16 %v752_v61, %v749_v56  ;;  %v783_v50 = vld [vmem:[#allocation9 + $0x440] sm:$0xff]  ;;  %v688_v56 = vld [vmem:[#allocation9 + $0x148] sm:$0xff]  ;;  %v786_v61 = vld [vmem:[#allocation9 + $0x458] sm:$0xff] }
  0xad   :  { %v1706_v57 = vpack.c.bf16 %v783_v50, %v780_v48  ;;  %v813_v48 = vld [vmem:[#allocation9 + $0x530] sm:$0xff]  ;;  %v1863_v50 = vld [vmem:[#allocation5 + $0x20] sm:$0xff] }
  0xae   :  { %1541 = vmatpush1.bf16.msra.mxu0 %v1540_v62  ;;  %1669 = vmatpush1.bf16.msra.mxu1 %v1668_v63  ;;  %v709_v62 = vld [vmem:[#allocation9 + $0x1f0] sm:$0xff]  ;;  %v712_v63 = vld [vmem:[#allocation9 + $0x208] sm:$0xff] }
  0xaf   :  { %1543 = vmatprep.subr.bf16.mxu0 %v1542_v0  ;;  %1671 = vmatprep.subr.bf16.mxu1 %v1670_v4  ;;  %v756_v0 = vld [vmem:[#allocation9 + $0x368] sm:$0xff]  ;;  %v1754_v4 = vpack.c.bf16 %v712_v63, %v709_v62  ;;  %v789_v62 = vld [vmem:[#allocation9 + $0x470] sm:$0xff] }
  0xb0   :  { %v1690_v8 = vpack.c.bf16 %v759_v1, %v756_v0 }
  0xb2   :  { %1545 = vmatpush1.bf16.msra.mxu0 %v1544_v10  ;;  %1673 = vmatpush1.bf16.msra.mxu1 %v1672_v12  ;;  %v715_v10 = vld [vmem:[#allocation9 + $0x220] sm:$0xff]  ;;  %v762_v12 = vld [vmem:[#allocation9 + $0x398] sm:$0xff] }
  0xb3   :  { %1547 = vmatprep.subr.bf16.mxu0 %v1546_v13  ;;  %1675 = vmatprep.subr.bf16.mxu1 %v1674_v18  ;;  %v1756_v13 = vpack.c.bf16 %v664_v7, %v661_v6  ;;  %v670_v18 = vld [vmem:[#allocation9 + $0xb8] sm:$0xff]  ;;  %v788_v6 = vld [vmem:[#allocation9 + $0x468] sm:$0xff]  ;;  %v793_v7 = vld [vmem:[#allocation9 + $0x490] sm:$0xff] }
  0xb6   :  { %1549 = vmatpush1.bf16.msra.mxu0 %v1548_v27  ;;  %1677 = vmatpush1.bf16.msra.mxu1 %v1676_v29  ;;  %v1696_v27 = vpack.c.bf16 %v764_v20, %v761_v15  ;;  %v1762_v29 = vpack.c.bf16 %v724_v23, %v721_v22  ;;  %v798_v20 = vld [vmem:[#allocation9 + $0x4b8] sm:$0xff]  ;;  %v801_v22 = vld [vmem:[#allocation9 + $0x4d0] sm:$0xff] }
  0xb7   :  { %1551 = vmatprep.subr.bf16.mxu0 %v1550_v30  ;;  %1679 = vmatprep.subr.bf16.mxu1 %v1678_v34  ;;  %v767_v30 = vld [vmem:[#allocation9 + $0x3c0] sm:$0xff]  ;;  %v770_v34 = vld [vmem:[#allocation9 + $0x3d8] sm:$0xff] }
  0xba   :  { %1553 = vmatpush1.bf16.msra.mxu0 %v1552_v41  ;;  %1681 = vmatpush1.bf16.msra.mxu1 %v1680_v42  ;;  %v773_v41 = vld [vmem:[#allocation9 + $0x3f0] sm:$0xff]  ;;  %v679_v42 = vld [vmem:[#allocation9 + $0x100] sm:$0xff] }
  0xbb   :  { %1747 = vmatprep.subr.bf16.mxu0 %v1746_v43  ;;  %1683 = vmatprep.subr.bf16.mxu1 %v1682_v46  ;;  %v682_v43 = vld [vmem:[#allocation9 + $0x118] sm:$0xff]  ;;  %v733_v46 = vld [vmem:[#allocation9 + $0x2b0] sm:$0xff]  ;;  %v1704_v52 = vpack.c.bf16 %v776_v45, %v773_v41  ;;  %v811_v45 = vld [vmem:[#allocation9 + $0x520] sm:$0xff] }
  0xbc   :  { %v1768_v51 = vpack.c.bf16 %v682_v43, %v679_v42  ;;  %v1770_v53 = vpack.c.bf16 %v736_v47, %v733_v46  ;;  %v757_v41 = vld [vmem:[#allocation9 + $0x370] sm:$0xff]  ;;  %v760_v42 = vld [vmem:[#allocation9 + $0x388] sm:$0xff]  ;;  %v1722_v43 = vpack.c.bf16 %v807_v36, %v804_v35  ;;  %v814_v46 = vld [vmem:[#allocation9 + $0x538] sm:$0xff] }
  0xbd   :  { %467 = vmatmul.mubr.f32.vlgmr.msra.gmra.mrb[0].mxu0 %v2045_v26  ;;  %904 = vmatmul.mubr.f32.vlgmr.msra.gmra.mrb[8].mxu1 %v2033_v49  ;;  %v718_v26 = vld [vmem:[#allocation9 + $0x238] sm:$0xff]  ;;  %v765_v49 = vld [vmem:[#allocation9 + $0x3b0] sm:$0xff] }
  0xbe   :  { %1749 = vmatpush3.bf16.msra.mxu0 %v1748_v54  ;;  %1685 = vmatpush1.bf16.msra.mxu1 %v1684_v55  ;;  %v1758_v14 = vpack.c.bf16 %v718_v26, %v715_v10  ;;  %v1694_v19 = vpack.c.bf16 %v765_v49, %v762_v12  ;;  %v779_v54 = vld [vmem:[#allocation9 + $0x420] sm:$0xff]  ;;  %v685_v55 = vld [vmem:[#allocation9 + $0x130] sm:$0xff]  ;;  %v810_v47 = vld [vmem:[#allocation9 + $0x518] sm:$0xff] }
  0xbf   :  { %472 = vmatprep.mubr.f32.mxu0 %v2047_v28  ;;  %1687 = vmatprep.subr.bf16.mxu1 %v1686_v59  ;;  %v1692_v28 = vpack.c.bf16 %v758_v9, %v755_v5  ;;  %v739_v59 = vld [vmem:[#allocation9 + $0x2e0] sm:$0xff]  ;;  %v1772_v63 = vpack.c.bf16 %v688_v56, %v685_v55  ;;  %v1708_v0 = vpack.c.bf16 %v782_v58, %v779_v54  ;;  %v792_v9 = vld [vmem:[#allocation9 + $0x488] sm:$0xff]  ;;  %v809_v55 = vld [vmem:[#allocation9 + $0x510] sm:$0xff] }
  0xc0   :  { %1751 = vmatprep.subr.bf16.mxu0 %v1750_v60  ;;  %909 = vmatprep.mubr.f32.mxu1 %v2036_v11  ;;  %v771_v11 = vld [vmem:[#allocation9 + $0x3e0] sm:$0xff]  ;;  %v742_v60 = vld [vmem:[#allocation9 + $0x2f8] sm:$0xff]  ;;  %v1710_v5 = vpack.c.bf16 %v789_v62, %v786_v61  ;;  %v1790_v54 = vpack.c.bf16 %v814_v46, %v811_v45  ;;  %v1726_v58 = vpack.c.bf16 %v813_v48, %v810_v47  ;;  %v820_v61 = vld [vmem:[#allocation9 + $0x568] sm:$0xff] }
  0xc1   :  { %473 = vmatmul.mubr.f32.gmra.mrb[2].mxu0 %v2051_v40  ;;  %910 = vmatmul.mubr.f32.gmra.mrb[10].mxu1 %v2038_v16  ;;  %v1698_v33 = vpack.c.bf16 %v771_v11, %v768_v24  ;;  %v777_v16 = vld [vmem:[#allocation9 + $0x410] sm:$0xff]  ;;  %v1774_v1 = vpack.c.bf16 %v742_v60, %v739_v59  ;;  %v795_v10 = vld [vmem:[#allocation9 + $0x4a0] sm:$0xff]  ;;  %v812_v59 = vld [vmem:[#allocation9 + $0x528] sm:$0xff] }
  0xc2   :  { %1753 = vmatpush3.bf16.msra.mxu0 %v1752_v2  ;;  %1057 = vmatprep.mubr.f32.mxu0 %v2029_v21  ;;  %v1760_v21 = vpack.c.bf16 %v670_v18, %v667_v17  ;;  %v1702_v44 = vpack.c.bf16 %v777_v16, %v774_v37  ;;  %v785_v2 = vld [vmem:[#allocation9 + $0x450] sm:$0xff]  ;;  %v1714_v15 = vpack.c.bf16 %v795_v10, %v792_v9  ;;  %v794_v17 = vld [vmem:[#allocation9 + $0x498] sm:$0xff]  ;;  %v799_v18 = vld [vmem:[#allocation9 + $0x4c0] sm:$0xff] }
  0xc3   :  { %1689 = vmatpush1.bf16.msra.mxu1 %v1688_v3  ;;  %1755 = vmatprep.subr.bf16.mxu0 %v1754_v4  ;;  %v691_v3 = vld [vmem:[#allocation9 + $0x160] sm:$0xff]  ;;  %v694_v4 = vld [vmem:[#allocation9 + $0x178] sm:$0xff]  ;;  %v1712_v12 = vpack.c.bf16 %v788_v6, %v785_v2  ;;  %v1862_v16 = vld [vmem:[#allocation5 + $0x28] sm:$0xff] }
  0xc4   :  { %1691 = vmatprep.subr.bf16.mxu1 %v1690_v8  ;;  %980 = vmatprep.mubr.f32.mxu1 %v2042_v25  ;;  %v1700_v25 = vpack.c.bf16 %v770_v34, %v767_v30  ;;  %v796_v8 = vld [vmem:[#allocation9 + $0x4a8] sm:$0xff]  ;;  %v1776_v26 = vpack.c.bf16 %v694_v4, %v691_v3  ;;  %v1718_v30 = vpack.c.bf16 %v801_v22, %v798_v20  ;;  %v1861_v34 = vld [vmem:[#allocation5] sm:$0xff]  ;;  %v817_v60 = vld [vmem:[#allocation9 + $0x550] sm:$0xff] }
  0xc5   :  { %v1778_v49 = vpack.c.bf16 %v796_v8, %v793_v7  ;;  %v763_v56 = vld [vmem:[#allocation9 + $0x3a0] sm:$0xff]  ;;  %v816_v62 = vld [vmem:[#allocation9 + $0x548] sm:$0xff]  ;;  %v1794_v2 = vpack.c.bf16 %v820_v61, %v817_v60  ;;  %v769_v4 = vld [vmem:[#allocation9 + $0x3d0] sm:$0xff] }
  0xc6   :  { %1757 = vmatpush3.bf16.msra.mxu0 %v1756_v13  ;;  %v791_v13 = vld [vmem:[#allocation9 + $0x480] sm:$0xff]  ;;  %v818_v7 = vld [vmem:[#allocation9 + $0x558] sm:$0xff]  ;;  %v832_v20 = vld [vmem:[#allocation9 + $0x5c8] sm:$0xff] }
  0xc7   :  { %1693 = vmatpush1.bf16.msra.mxu1 %v1692_v28  ;;  %1759 = vmatprep.subr.bf16.mxu0 %v1758_v14  ;;  %v745_v28 = vld [vmem:[#allocation9 + $0x310] sm:$0xff]  ;;  %v748_v14 = vld [vmem:[#allocation9 + $0x328] sm:$0xff]  ;;  %v1716_v24 = vpack.c.bf16 %v794_v17, %v791_v13  ;;  %v815_v3 = vld [vmem:[#allocation9 + $0x540] sm:$0xff] }
  0xc8   :  { %1695 = vmatprep.subr.bf16.mxu1 %v1694_v19  ;;  %v802_v19 = vld [vmem:[#allocation9 + $0x4d8] sm:$0xff]  ;;  %v1780_v23 = vpack.c.bf16 %v748_v14, %v745_v28  ;;  %v823_v8 = vld [vmem:[#allocation9 + $0x580] sm:$0xff]  ;;  %v821_v28 = vld [vmem:[#allocation9 + $0x570] sm:$0xff] }
  0xc9   :  { %v1782_v11 = vpack.c.bf16 %v802_v19, %v799_v18  ;;  %v826_v9 = vld [vmem:[#allocation9 + $0x598] sm:$0xff]  ;;  %v775_v14 = vld [vmem:[#allocation9 + $0x400] sm:$0xff]  ;;  %v824_v18 = vld [vmem:[#allocation9 + $0x588] sm:$0xff] }
  0xca   :  { %1761 = vmatpush3.bf16.msra.mxu0 %v1760_v21  ;;  %v797_v21 = vld [vmem:[#allocation9 + $0x4b0] sm:$0xff]  ;;  %v822_v10 = vld [vmem:[#allocation9 + $0x578] sm:$0xff]  ;;  %v1798_v13 = vpack.c.bf16 %v826_v9, %v823_v8  ;;  %v828_v22 = vld [vmem:[#allocation9 + $0x5a8] sm:$0xff]  ;;  %v75_v8 = vlaneseq }
  0xcb   :  { %1697 = vmatpush1.bf16.msra.mxu1 %v1696_v27  ;;  %1763 = vmatprep.subr.bf16.mxu0 %v1762_v29  ;;  %v751_v27 = vld [vmem:[#allocation9 + $0x340] sm:$0xff]  ;;  %v754_v29 = vld [vmem:[#allocation9 + $0x358] sm:$0xff]  ;;  %v829_v19 = vld [vmem:[#allocation9 + $0x5b0] sm:$0xff] }
  0xcc   :  { %1699 = vmatprep.subr.bf16.mxu1 %v1698_v33  ;;  %v808_v33 = vld [vmem:[#allocation9 + $0x508] sm:$0xff]  ;;  %v1784_v37 = vpack.c.bf16 %v754_v29, %v751_v27  ;;  %v827_v27 = vld [vmem:[#allocation9 + $0x5a0] sm:$0xff]  ;;  %v781_v29 = vld [vmem:[#allocation9 + $0x430] sm:$0xff]  ;;  %v76_v9 = vshrl.u32 %v75_v8, 7 }
  0xcd   :  { %v834_v35 = vld [vmem:[#allocation9 + $0x5d8] sm:$0xff]  ;;  %v837_v36 = vld [vmem:[#allocation9 + $0x5f0] sm:$0xff] }
  0xce   :  { %1765 = vmatpush3.bf16.msra.mxu0 %v1764_v38  ;;  %v1720_v38 = vpack.c.bf16 %v800_v31, %v797_v21  ;;  %v1802_v21 = vpack.c.bf16 %v832_v20, %v829_v19  ;;  %v1865_v46 = vld [vmem:[#allocation5 + $0x10] sm:$0xff]  ;;  %v1866_v47 = vld [vmem:[#allocation5 + $0x38] sm:$0xff] }
  0xcf   :  { %1701 = vmatpush1.bf16.msra.mxu1 %v1700_v25  ;;  %1767 = vmatprep.subr.bf16.mxu0 %v1766_v39  ;;  %v1786_v25 = vpack.c.bf16 %v808_v33, %v805_v32  ;;  %v803_v39 = vld [vmem:[#allocation9 + $0x4e0] sm:$0xff]  ;;  %v830_v32 = vld [vmem:[#allocation9 + $0x5b8] sm:$0xff] }
  0xd0   :  { %1703 = vmatprep.subr.bf16.mxu1 %v1702_v44  ;;  %v806_v44 = vld [vmem:[#allocation9 + $0x4f8] sm:$0xff]  ;;  %v835_v33 = vld [vmem:[#allocation9 + $0x5e0] sm:$0xff] }
  0xd2   :  { %1769 = vmatpush3.bf16.msra.mxu0 %v1768_v51  ;;  %v1788_v51 = vpack.c.bf16 %v760_v42, %v757_v41  ;;  %v1742_v41 = vpack.c.bf16 %v837_v36, %v834_v35  ;;  %v833_v42 = vld [vmem:[#allocation9 + $0x5d0] sm:$0xff] }
  0xd3   :  { %1705 = vmatpush1.bf16.msra.mxu1 %v1704_v52  ;;  %1771 = vmatprep.subr.bf16.mxu0 %v1770_v53  ;;  %v1864_v52 = vld [vmem:[#allocation5 + $0x18] sm:$0xff]  ;;  %v1724_v53 = vpack.c.bf16 %v806_v44, %v803_v39 }
  0xd4   :  { %1707 = vmatprep.subr.bf16.mxu1 %v1706_v57  ;;  %v766_v57 = vld [vmem:[#allocation9 + $0x3b8] sm:$0xff] }
  0xd5   :  { %v790_v39 = vld [vmem:[#allocation9 + $0x478] sm:$0xff] }
  0xd6   :  { %1773 = vmatpush3.bf16.msra.mxu0 %v1772_v63  ;;  %v819_v63 = vld [vmem:[#allocation9 + $0x560] sm:$0xff] }
  0xd7   :  { %1709 = vmatpush1.bf16.msra.mxu1 %v1708_v0  ;;  %1775 = vmatprep.subr.bf16.mxu0 %v1774_v1  ;;  %v1792_v0 = vpack.c.bf16 %v766_v57, %v763_v56  ;;  %v1728_v1 = vpack.c.bf16 %v812_v59, %v809_v55  ;;  %v1730_v6 = vpack.c.bf16 %v819_v63, %v816_v62 }
  0xd8   :  { %1711 = vmatprep.subr.bf16.mxu1 %v1710_v5  ;;  %v772_v5 = vld [vmem:[#allocation9 + $0x3e8] sm:$0xff] }
  0xda   :  { %1777 = vmatpush3.bf16.msra.mxu0 %v1776_v26  ;;  %v825_v26 = vld [vmem:[#allocation9 + $0x590] sm:$0xff] }
  0xdb   :  { %1713 = vmatpush1.bf16.msra.mxu1 %v1712_v12  ;;  %1779 = vmatprep.subr.bf16.mxu0 %v1778_v49  ;;  %v1796_v12 = vpack.c.bf16 %v772_v5, %v769_v4  ;;  %v1732_v49 = vpack.c.bf16 %v818_v7, %v815_v3  ;;  %v1734_v17 = vpack.c.bf16 %v825_v26, %v822_v10  ;;  %v96_v10 = vld [vmem:[%s2106_s4] sm:$0x7]  ;;  %v2074_v26 = vsub.s32 0, %v76_v9 }
  0xdc   :  { %1715 = vmatprep.subr.bf16.mxu1 %v1714_v15  ;;  %v778_v15 = vld [vmem:[#allocation9 + $0x418] sm:$0xff] }
  0xdd   :  { %1058 = vmatmul.mubr.f32.vlgmr.msra.gmra.mrb[4].mxu0 %v1861_v34  ;;  %v838_v34 = vld [vmem:[#allocation9 + $0x5f8] sm:$0xff] }
  0xde   :  { %1781 = vmatpush3.bf16.msra.mxu0 %v1780_v23  ;;  %1062 = vmatprep.mubr.f32.mxu0 %v1862_v16  ;;  %v831_v23 = vld [vmem:[#allocation9 + $0x5c0] sm:$0xff]  ;;  %v1740_v16 = vpack.c.bf16 %v830_v32, %v827_v27 }
  0xdf   :  { %1717 = vmatpush1.bf16.msra.mxu1 %v1716_v24  ;;  %1783 = vmatprep.subr.bf16.mxu0 %v1782_v11  ;;  %v1800_v24 = vpack.c.bf16 %v778_v15, %v775_v14  ;;  %v1736_v11 = vpack.c.bf16 %v824_v18, %v821_v28  ;;  %v1738_v31 = vpack.c.bf16 %v831_v23, %v828_v22  ;;  %v2080_v28 = vsub.s32 2, %v76_v9  ;;  %v73_v27 = vld [vmem:[%s2104_s2] sm:$0x7] }
  0xe0   :  { %1719 = vmatprep.subr.bf16.mxu1 %v1718_v30  ;;  %v784_v30 = vld [vmem:[#allocation9 + $0x448] sm:$0xff] }
  0xe1   :  { %1063 = vmatmul.mubr.f32.gmra.mrb[6].mxu0 %v1863_v50  ;;  %v109_v20 = vrot.slane %v96_v10, %v2080_v28 }
  0xe2   :  { %1785 = vmatpush3.bf16.msra.mxu0 %v1784_v37  ;;  %1132 = vmatprep.mubr.f32.mxu0 %v1864_v52  ;;  %v1804_v37 = vpack.c.bf16 %v784_v30, %v781_v29 }
  0xe3   :  { %1721 = vmatpush1.bf16.msra.mxu1 %v1720_v38  ;;  %1787 = vmatprep.subr.bf16.mxu0 %v1786_v25  ;;  %v1806_v38 = vpack.c.bf16 %v838_v34, %v835_v33  ;;  %v787_v25 = vld [vmem:[#allocation9 + $0x460] sm:$0xff] }
  0xe4   :  { %1723 = vmatprep.subr.bf16.mxu1 %v1722_v43  ;;  %v836_v43 = vld [vmem:[#allocation9 + $0x5e8] sm:$0xff]  ;;  %v1808_v44 = vpack.c.bf16 %v790_v39, %v787_v25  ;;  %v78_v39 = vrot.slane %v73_v27, %v2074_v26 }
  0xe5   :  { %v1744_v45 = vpack.c.bf16 %v836_v43, %v833_v42 }
  0xe6   :  { %1789 = vmatpush3.bf16.msra.mxu0 %v1788_v51 }
  0xe7   :  { %1725 = vmatpush1.bf16.msra.mxu1 %v1724_v53  ;;  %1791 = vmatprep.subr.bf16.mxu0 %v1790_v54 }
  0xe8   :  { %1727 = vmatprep.subr.bf16.mxu1 %v1726_v58 }
  0xea   :  { %1793 = vmatpush3.bf16.msra.mxu0 %v1792_v0 }
  0xeb   :  { %1729 = vmatpush1.bf16.msra.mxu1 %v1728_v1  ;;  %1795 = vmatprep.subr.bf16.mxu0 %v1794_v2 }
  0xec   :  { %1731 = vmatprep.subr.bf16.mxu1 %v1730_v6 }
  0xee   :  { %1797 = vmatpush3.bf16.msra.mxu0 %v1796_v12  ;;  %v2076_v12 = vsub.s32 1, %v76_v9 }
  0xef   :  { %1733 = vmatpush1.bf16.msra.mxu1 %v1732_v49  ;;  %1799 = vmatprep.subr.bf16.mxu0 %v1798_v13  ;;  %v101_v49 = vrot.slane %v96_v10, %v2074_v26 }
  0xf0   :  { %1735 = vmatprep.subr.bf16.mxu1 %v1734_v17  ;;  %v105_v13 = vrot.slane %v96_v10, %v2076_v12  ;;  %v82_v42 = vrot.slane %v73_v27, %v2076_v12 }
  0xf2   :  { %1801 = vmatpush3.bf16.msra.mxu0 %v1800_v24 }
  0xf3   :  { %1737 = vmatpush1.bf16.msra.mxu1 %v1736_v11  ;;  %1803 = vmatprep.subr.bf16.mxu0 %v1802_v21 }
  0xf4   :  { %1739 = vmatprep.subr.bf16.mxu1 %v1738_v31 }
  0xf6   :  { %1805 = vmatpush3.bf16.msra.mxu0 %v1804_v37  ;;  %v86_v37 = vrot.slane %v73_v27, %v2080_v28 }
  0xf7   :  { %1741 = vmatpush1.bf16.msra.mxu1 %v1740_v16  ;;  %1807 = vmatprep.subr.bf16.mxu0 %v1806_v38 }
  0xf8   :  { %1743 = vmatprep.subr.bf16.mxu1 %v1742_v41 }
  0xfa   :  { %1809 = vmatpush3.bf16.msra.mxu0 %v1808_v44 }
  0xfb   :  { %1745 = vmatpush1.bf16.msra.mxu1 %v1744_v45 }
  0xfd   :  { %1133 = vmatmul.mubr.f32.vlgmr.msra.gmra.mrb[8].mxu0 %v1865_v46 }
  0xfe   :  { %981 = vmatmul.mubr.f32.vlgmr.msra.gmra.mrb[8].mxu1 %v1865_v46  ;;  %1137 = vmatprep.mubr.f32.mxu0 %v1866_v47 }
  0xff   :  { %986 = vmatprep.mubr.f32.mxu1 %v1866_v47 }
 0x101   :  { %1138 = vmatmul.mubr.f32.gmra.mrb[10].mxu0 %v2051_v40 }
 0x102   :  { %987 = vmatmul.mubr.f32.gmra.mrb[10].mxu1 %v2051_v40 }
 0x130   :  { %v1306_v48 = vpop.f32.mrb[0].mxu1 }
 0x131   :  { %v1307_v50 = vpop.f32.mrb[1].mxu1 }
 0x132   :  { %v1308_v51 = vadd.f32 %v1307_v50, %v1306_v48 }
 0x134   :  { %v1309_v52 = vpop.f32.mrb[2].mxu1 }
 0x135   :  { %v1310_v53 = vpop.f32.mrb[3].mxu1 }
 0x136   :  { %v1311_v54 = vadd.f32 %v1310_v53, %v1309_v52 }
 0x150   :  { %v1344_v55 = vpop.f32.mrb[4].mxu1 }
 0x151   :  { %v1345_v56 = vpop.f32.mrb[5].mxu1 }
 0x152   :  { %v1346_v57 = vadd.f32 %v1345_v56, %v1344_v55 }
 0x154   :  { %v621_v58 = vadd.f32 %v1346_v57, %v1308_v51  ;;  %v1347_v59 = vpop.f32.mrb[6].mxu1 }
 0x155   :  { %v1348_v60 = vpop.f32.mrb[7].mxu1 }
 0x156   :  { %v1349_v61 = vadd.f32 %v1348_v60, %v1347_v59  ;;  %v631_v44 = vadd.f32 %v621_v58, %v86_v37 }
 0x158   :  { %v2069_v62 = vadd.f32 %v1349_v61, %v1311_v54 }
 0x15a   :  { %v634_v59 = vadd.f32 %v2069_v62, %v86_v37 }
 0x190   :  { %v468_v63 = vpop.f32.mrb[0].mxu0 }
 0x191   :  { %v470_v0 = vpop.f32.mrb[1].mxu0  ;;  %v629_v46 = vadd.f32 %v468_v63, %v78_v39 }
 0x192   :  { %v630_v47 = vadd.f32 %v470_v0, %v82_v42 }
 0x194   :  { %v474_v1 = vpop.f32.mrb[2].mxu0 }
 0x195   :  { %v476_v2 = vpop.f32.mrb[3].mxu0  ;;  %v632_v51 = vadd.f32 %v474_v1, %v78_v39  ;;  %v1218_v1 = vld [vmem:[%s2107_s5] sm:$0x7] }
 0x196   :  { %v633_v53 = vadd.f32 %v476_v2, %v82_v42 }
 0x1b0   :  { %v1382_v40 = vpop.f32.mrb[4].mxu0 }
 0x1b1   :  { %v1383_v3 = vpop.f32.mrb[5].mxu0 }
 0x1b2   :  { %v1384_v4 = vadd.f32 %v1383_v3, %v1382_v40 }
 0x1b4   :  { %v1385_v5 = vpop.f32.mrb[6].mxu0 }
 0x1b5   :  { %v1386_v6 = vpop.f32.mrb[7].mxu0 }
 0x1b6   :  { %v1387_v7 = vadd.f32 %v1386_v6, %v1385_v5  ;;  %v1227_v5 = vrot.slane %v1218_v1, %v2076_v12 }
 0x1d0   :  { %v1420_v14 = vpop.f32.mrb[8].mxu0 }
 0x1d1   :  { %v982_v15 = vpop.f32.mrb[8].mxu1  ;;  %v1421_v17 = vpop.f32.mrb[9].mxu0 }
 0x1d2   :  { %v1143_v18 = vadd.f32 %v982_v15, %v101_v49  ;;  %v984_v19 = vpop.f32.mrb[9].mxu1  ;;  %v1422_v22 = vadd.f32 %v1421_v17, %v1420_v14 }
 0x1d3   :  { %v1144_v23 = vadd.f32 %v984_v19, %v105_v13 }
 0x1d4   :  { %v1267_v24 = vmul.f32 -1.442695, %v1143_v18  ;;  %v1135_v11 = vadd.f32 %v1422_v22, %v1384_v4  ;;  %v1423_v21 = vpop.f32.mrb[10].mxu0  ;;  %v1223_v4 = vrot.slane %v1218_v1, %v2074_v26 }
 0x1d5   :  { %v1268_v29 = vmul.f32 -1.442695, %v1144_v23  ;;  %v988_v30 = vpop.f32.mrb[10].mxu1  ;;  %v1424_v31 = vpop.f32.mrb[11].mxu0 }
 0x1d6   :  { %1825 = vpow2.f32 %v1267_v24  ;;  %v1145_v32 = vadd.f32 %v1135_v11, %v109_v20  ;;  %v1146_v33 = vadd.f32 %v988_v30, %v101_v49  ;;  %v990_v34 = vpop.f32.mrb[11].mxu1  ;;  %v1425_v35 = vadd.f32 %v1424_v31, %v1423_v21 }
 0x1d7   :  { %1827 = vpow2.f32 %v1268_v29  ;;  %v1147_v36 = vadd.f32 %v990_v34, %v105_v13  ;;  %v1231_v49 = vrot.slane %v1218_v1, %v2080_v28 }
 0x1d8   :  { %v1269_v16 = vmul.f32 -1.442695, %v1145_v32  ;;  %v1270_v38 = vmul.f32 -1.442695, %v1146_v33  ;;  %v1140_v25 = vadd.f32 %v1425_v35, %v1387_v7  ;;  %v1273_v32 = vld [vmem:[#allocation4] ss:$0 sm:$0xff] }
 0x1d9   :  { %v1271_v41 = vmul.f32 -1.442695, %v1147_v36 }
 0x1da   :  { %1829 = vpow2.f32 %v1269_v16  ;;  %v1148_v43 = vadd.f32 %v1140_v25, %v109_v20 }
 0x1db   :  { %1831 = vpow2.f32 %v1270_v38 }
 0x1dc   :  { %1833 = vpow2.f32 %v1271_v41  ;;  %v1272_v45 = vmul.f32 -1.442695, %v1148_v43 }
 0x1de   :  { %1835 = vpow2.f32 %v1272_v45 }
 0x1df   :  { %1837 = vtanh.f32 %v631_v44 }
 0x1e0   :  { %v1826_v48 = vpop.eup %1825  ;;  %1839 = vtanh.f32 %v629_v46 }
 0x1e1   :  { %v1828_v50 = vpop.eup %1827  ;;  %v1194_v52 = vadd.f32 1.0, %v1826_v48  ;;  %1841 = vtanh.f32 %v630_v47 }
 0x1e2   :  { %v1195_v54 = vadd.f32 1.0, %v1828_v50 }
 0x1e3   :  { %1843 = vrcp.f32 %v1194_v52 }
 0x1e4   :  { %v1830_v55 = vpop.eup %1829  ;;  %1845 = vrcp.f32 %v1195_v54 }
 0x1e5   :  { %v1832_v56 = vpop.eup %1831  ;;  %1847 = vtanh.f32 %v632_v51  ;;  %v1196_v57 = vadd.f32 1.0, %v1830_v55 }
 0x1e6   :  { %v1834_v58 = vpop.eup %1833  ;;  %1849 = vtanh.f32 %v633_v53  ;;  %v1197_v60 = vadd.f32 1.0, %v1832_v56 }
 0x1e7   :  { %1851 = vrcp.f32 %v1196_v57  ;;  %v1198_v61 = vadd.f32 1.0, %v1834_v58 }
 0x1e8   :  { %v1836_v63 = vpop.eup %1835  ;;  %1853 = vrcp.f32 %v1197_v60 }
 0x1e9   :  { %1855 = vrcp.f32 %v1198_v61  ;;  %v1199_v0 = vadd.f32 1.0, %v1836_v63  ;;  %v1838_v2 = vpop.eup %1837 }
 0x1ea   :  { %1857 = vtanh.f32 %v634_v59  ;;  %v1840_v40 = vpop.eup %1839 }
 0x1eb   :  { %1859 = vrcp.f32 %v1199_v0  ;;  %v1842_v3 = vpop.eup %1841 }
 0x1ed   :  { %v1844_v62 = vpop.eup %1843 }
 0x1ee   :  { %v1846_v6 = vpop.eup %1845  ;;  %v1212_v7 = vmul.f32 %v1844_v62, %v1840_v40 }
 0x1ef   :  { %v1848_v8 = vpop.eup %1847  ;;  %v1213_v9 = vmul.f32 %v1846_v6, %v1842_v3 }
 0x1f0   :  { %v1850_v10 = vpop.eup %1849  ;;  %v1235_v13 = vmul.f32 %v1223_v4, %v1212_v7 }
 0x1f1   :  { %v1852_v14 = vpop.eup %1851  ;;  %v1236_v15 = vmul.f32 %v1227_v5, %v1213_v9 }
 0x1f2   :  { %v1854_v17 = vpop.eup %1853  ;;  %v1214_v18 = vmul.f32 %v1852_v14, %v1838_v2 }
 0x1f3   :  { %v1856_v19 = vpop.eup %1855  ;;  %v1241_v20 = vadd.f32 %v1236_v15, %v1235_v13  ;;  %v1215_v22 = vmul.f32 %v1854_v17, %v1848_v8 }
 0x1f4   :  { %v1858_v23 = vpop.eup %1857  ;;  %v1237_v26 = vmul.f32 %v1231_v49, %v1214_v18  ;;  %v1216_v24 = vmul.f32 %v1856_v19, %v1850_v10 }
 0x1f5   :  { %v1860_v11 = vpop.eup %1859  ;;  %v1238_v12 = vmul.f32 %v1223_v4, %v1215_v22 }
 0x1f6   :  { %v1242_v21 = vadd.f32 %v1241_v20, %v1237_v26  ;;  %v1217_v27 = vmul.f32 %v1860_v11, %v1858_v23  ;;  %v1239_v29 = vmul.f32 %v1227_v5, %v1216_v24 }
 0x1f8   :  { %1243 = vadd.xlane.f32.xlu0 %v1242_v21  ;;  %v1240_v30 = vmul.f32 %v1231_v49, %v1217_v27  ;;  %v1245_v31 = vadd.f32 %v1239_v29, %v1238_v12 }
 0x1fa   :  { %v1246_v28 = vadd.f32 %v1245_v31, %v1240_v30 }
 0x1fc   :  { %1247 = vadd.xlane.f32.xlu0 %v1246_v28 }
 0x285   :  { %v1244_v33 = vpop.xlane.xlu0 %1243 }
 0x286   :  { %v1256_v34 = vadd.f32 %v1273_v32, %v1244_v33 }
 0x288   :  { %1259 = vst.msk [vmem:[%s2109_s7] sm:$0xff] %vm1258_vm0, %v1256_v34 }
 0x289   :  { %v1248_v35 = vpop.xlane.xlu0 %1247 }
 0x28a   :  { %v1257_v36 = vadd.f32 %v1273_v32, %v1248_v35 }
 0x28c   :  { %1260 = vst.msk [vmem:[%s2109_s7 + $0x8] sm:$0xff] %vm1258_vm0, %v1257_v36 }
 0x28d   :  { %1265 = vsyncpa [#allocation6], 1 }
 0x28e   :  { %1266 = vsyncpa [#allocation8], 1 }

</bundles_post_ra>
